<compile_context>
chip_gen: v5e
topology: v5e:2x2
jax: 0.10.0
libtpu: 0.0.40
codegen_flags: <defaults>
</compile_context>

<pallas_src>
import functools

import jax
import jax.numpy as jnp
from jax import lax
from jax.experimental import pallas as pl
from jax.experimental.pallas import tpu as pltpu

BN_EPS = 1e-5
EXPANSION = 4


# ---------------------------------------------------------------------------
# Pallas kernel: one (batch block, row block) per grid step.
# ---------------------------------------------------------------------------
def _bottleneck_kernel(x_ref, xt_ref, xb_ref,
                       w1_ref, b1_ref, w2_ref, b2_ref, w3_ref, b3_ref,
                       out_ref, h1w_ref):
    NB, TH, W, Cin = x_ref.shape
    P = w1_ref.shape[1]
    Cout = w3_ref.shape[1]

    # ---- conv1 (1x1) + folded bn1 + relu ------------------------------------
    def conv1(v, rows):
        h = jnp.dot(v.reshape(NB * rows * W, Cin), w1_ref[...],
                    preferred_element_type=jnp.float32)
        h = jnp.maximum(h + b1_ref[...], 0.0)
        return h.astype(jnp.bfloat16).reshape(NB, rows, W, P)

    h1_mid = conv1(x_ref[...], TH)      # main row block
    h1_top = conv1(xt_ref[...], 1)      # 1-row top halo
    h1_bot = conv1(xb_ref[...], 1)      # 1-row bottom halo
    h1 = jnp.concatenate([h1_top, h1_mid, h1_bot], axis=1)   # (NB, TH+2, W, P)

    # ---- im2col along W, dx-major scratch; each slab stored exactly once ----
    #      slab dx (in {0,1,2}) at output column x holds input column x+dx-1.
    zcol = jnp.zeros((NB, TH + 2, 1, P), jnp.bfloat16)
    h1w_ref[0 * NB:1 * NB] = jnp.concatenate([zcol, h1[:, :, :W - 1, :]], axis=2)
    h1w_ref[1 * NB:2 * NB] = h1
    h1w_ref[2 * NB:3 * NB] = jnp.concatenate([h1[:, :, 1:, :], zcol], axis=2)

    # conv2's zero padding applies in h1 space (relu(bias) != 0), so the halo
    # rows that fall outside the image must be zeroed.  Only the two halo rows
    # are touched, and only at image borders.
    hblk = pl.program_id(1)
    nblk = pl.num_programs(1)

    @pl.when(hblk == 0)
    def _():
        h1w_ref[:, 0:1] = jnp.zeros((3 * NB, 1, W, P), jnp.bfloat16)

    @pl.when(hblk == nblk - 1)
    def _():
        h1w_ref[:, TH + 1:TH + 2] = jnp.zeros((3 * NB, 1, W, P), jnp.bfloat16)

    # ---- conv2 (3x3, stride 1, pad 1) + folded bn2 + relu --------------------
    #      9 K=P MXU matmuls, accumulated in a value (no VMEM round-trips).
    acc = None
    for dy in range(3):
        for dx in range(3):
            tap = h1w_ref[dx * NB:(dx + 1) * NB, dy:dy + TH]
            t = jnp.dot(tap.reshape(NB * TH * W, P), w2_ref[dy * 3 + dx],
                        preferred_element_type=jnp.float32)
            acc = t if acc is None else acc + t
    h2 = jnp.maximum(acc + b2_ref[...], 0.0).astype(jnp.bfloat16)

    # ---- conv3 (1x1) + folded bn3 + identity residual + relu -----------------
    h3 = jnp.dot(h2, w3_ref[...], preferred_element_type=jnp.float32) + b3_ref[...]
    res = x_ref[...].reshape(NB * TH * W, Cin).astype(jnp.float32)
    out = jnp.maximum(h3 + res, 0.0)
    out_ref[...] = out.reshape(NB, TH, W, Cout).astype(out_ref.dtype)


# ---------------------------------------------------------------------------
# Wrapper
# ---------------------------------------------------------------------------
def _vmem_capacity_bytes():
    try:
        return int(pltpu.get_tpu_info().vmem_capacity_bytes)
    except Exception:
        return 128 * 1024 * 1024     # v5e / v6e fallback


def _pick_divisor_block(total, target):
    b = max(1, min(total, target))
    while total % b:
        b -= 1
    return b


def bottleneck_forward_nhwc(x, params, row_block=None, batch_block=None,
                            out_dtype=jnp.bfloat16):
    """x: (N, H, W, Cin); returns (N, H, W, Cout) in out_dtype (default bf16)."""
    w1, b1, w2, b2, w3, b3 = params
    N, H, W, Cin = x.shape
    P = w1.shape[1]
    Cout = w3.shape[1]
    assert Cin == Cout, "identity residual requires inplanes == planes * EXPANSION"

    vmem_cap = _vmem_capacity_bytes()
    # Bigger row blocks on the 128-MiB-VMEM parts (v5e/v6e); smaller on v7x.
    row_target = 64 if vmem_cap >= 100 * 2 ** 20 else 32
    TH = _pick_divisor_block(H, row_target if row_block is None else row_block)
    nH = H // TH
    # Batch-block deep stages with tiny spatial extent so the MXU sees M ~ 512.
    NB = (_pick_divisor_block(N, max(1, 512 // (TH * W)))
          if batch_block is None else _pick_divisor_block(N, batch_block))

    xb16 = x.astype(jnp.bfloat16)

    # Per-row-block halo rows (row h*TH-1 above, row (h+1)*TH below; zeros at
    # the image border).  Tiny extra HBM traffic (2/TH of x) but keeps every
    # operand on the auto-pipelined BlockSpec path.
    zero_row = jnp.zeros((N, 1, W, Cin), jnp.bfloat16)
    if nH > 1:
        tops = xb16[:, TH - 1:(nH - 1) * TH:TH, :, :]
        bots = xb16[:, TH::TH, :, :]
        x_top = jnp.concatenate([zero_row, tops], axis=1)   # (N, nH, W, Cin)
        x_bot = jnp.concatenate([bots, zero_row], axis=1)   # (N, nH, W, Cin)
    else:
        x_top = zero_row
        x_bot = zero_row

    # VMEM budget: double-buffered bf16 activation blocks, single-buffered
    # resident weights, the dx-major im2col scratch, plus value transients.
    # Capped well below physical VMEM (~48 MiB on v7x, ~96 MiB on v5e/v6e).
    blk = 2 * NB * (TH * W * Cin * 2 + 2 * W * Cin * 2 + TH * W * Cout * 2)
    wts = (Cin * P + 9 * P * P + P * Cout) * 2 + (2 * P + Cout) * 4
    scratch = 3 * NB * (TH + 2) * W * P * 2
    transients = NB * (TH + 2) * W * P * 2 * 4 + 3 * NB * TH * W * max(P, Cout) * 4
    vmem_limit = int(min(min(100 * 2 ** 20, (vmem_cap * 3) // 4),
                         max(32 * 2 ** 20, blk + wts + scratch + transients)))

    flops = 2 * N * H * W * (Cin * P + 9 * P * P + P * Cout)
    bytes_accessed = ((xb16.size + x_top.size + x_bot.size) * 2
                      + N * H * W * Cout * 2
                      + (Cin * P + 9 * P * P + P * Cout) * 2 + (2 * P + Cout) * 4)

    resident = pl.BlockSpec(memory_space=pltpu.MemorySpace.VMEM)  # single-buffered

    out = pl.pallas_call(
        _bottleneck_kernel,
        out_shape=jax.ShapeDtypeStruct((N, H, W, Cout), out_dtype),
        grid=(N // NB, nH),
        in_specs=[
            pl.BlockSpec((NB, TH, W, Cin), lambda n, h: (n, h, 0, 0)),   # x block
            pl.BlockSpec((NB, 1, W, Cin), lambda n, h: (n, h, 0, 0)),    # top halo
            pl.BlockSpec((NB, 1, W, Cin), lambda n, h: (n, h, 0, 0)),    # bottom halo
            resident, resident,                                          # w1, b1
            resident, resident,                                          # w2, b2
            resident, resident,                                          # w3, b3
        ],
        out_specs=pl.BlockSpec((NB, TH, W, Cout), lambda n, h: (n, h, 0, 0)),
        scratch_shapes=[
            pltpu.VMEM((3 * NB, TH + 2, W, P), jnp.bfloat16),  # dx-major im2col
        ],
        # NOTE(v7x): if xprof shows one TensorCore idle, switch the batch axis
        # to pltpu.CORE_PARALLEL (or pl.core_map) so both TCs split the grid.
        compiler_params=pltpu.CompilerParams(
            dimension_semantics=("parallel", "parallel"),
            vmem_limit_bytes=vmem_limit),
        cost_estimate=pl.CostEstimate(flops=flops, transcendentals=0,
                                      bytes_accessed=bytes_accessed),
    )(xb16, x_top, x_bot, w1, b1, w2, b2, w3, b3)
    return out


@functools.partial(jax.jit, static_argnames=("row_block", "batch_block"))
def bottleneck_forward(x_nchw, params, row_block=None, batch_block=None):
    """PyTorch-layout entry point.  In a real model keep NHWC end-to-end and
    call bottleneck_forward_nhwc directly (the transposes are extra HBM passes)."""
    x = jnp.transpose(x_nchw, (0, 2, 3, 1))                 # NCHW -> NHWC
    out = bottleneck_forward_nhwc(x, params, row_block=row_block,
                                  batch_block=batch_block)
    return jnp.transpose(out, (0, 3, 1, 2))                 # NHWC -> NCHW


# ---------------------------------------------------------------------------
# Parameter setup (deterministic, in-script) and BN folding
# ---------------------------------------------------------------------------
def init_params(key, inplanes, planes):
    ks = jax.random.split(key, 6)
    conv1_w = jax.random.normal(ks[0], (planes, inplanes, 1, 1), jnp.float32) * 0.1
    conv2_w = jax.random.normal(ks[1], (planes, planes, 3, 3), jnp.float32) * 0.1
    conv3_w = jax.random.normal(ks[2], (planes * EXPANSION, planes, 1, 1),
                                jnp.float32) * 0.1

    def bn_params(k, c):
        k1, k2, k3, k4 = jax.random.split(k, 4)
        gamma = jax.random.uniform(k1, (c,), minval=0.5, maxval=1.5)
        beta = jax.random.normal(k2, (c,)) * 0.1
        mean = jax.random.normal(k3, (c,)) * 0.1
        var = jax.random.uniform(k4, (c,), minval=0.5, maxval=1.5)
        return gamma, beta, mean, var

    return (conv1_w, conv2_w, conv3_w,
            bn_params(ks[3], planes), bn_params(ks[4], planes),
            bn_params(ks[5], planes * EXPANSION))


def fold_bn(gamma, beta, mean, var):
    scale = gamma / jnp.sqrt(var + BN_EPS)
    bias = beta - mean * scale
    return scale, bias


def prepare_params(conv1_w, conv2_w, conv3_w, bn1, bn2, bn3):
    """Fold eval-mode BN into the conv weights (bf16) + f32 biases; lay conv2
    out as (9, P, P) so each (dy,dx) tap is one K=P MXU matmul."""
    s1, b1 = fold_bn(*bn1)
    s2, b2 = fold_bn(*bn2)
    s3, b3 = fold_bn(*bn3)
    P = conv2_w.shape[0]

    w1 = (conv1_w[:, :, 0, 0].T * s1[None, :]).astype(jnp.bfloat16)        # (Cin, P)
    w2 = jnp.transpose(conv2_w, (2, 3, 1, 0)) * s2[None, None, None, :]    # (kh,kw,in,out)
    w2 = w2.reshape(9, P, P).astype(jnp.bfloat16)                          # (9, P, P)
    w3 = (conv3_w[:, :, 0, 0].T * s3[None, :]).astype(jnp.bfloat16)        # (P, 4P)

    return (w1, b1.reshape(1, -1).astype(jnp.float32),
            w2, b2.reshape(1, -1).astype(jnp.float32),
            w3, b3.reshape(1, -1).astype(jnp.float32))


# ---------------------------------------------------------------------------
# Pure-JAX f32 reference (matches the PyTorch module in eval mode)
# ---------------------------------------------------------------------------
def reference(x, conv1_w, conv2_w, conv3_w, bn1, bn2, bn3):
    def conv(x, w, pad):
        return lax.conv_general_dilated(x, w, (1, 1), [(pad, pad), (pad, pad)],
                                        dimension_numbers=('NCHW', 'OIHW', 'NCHW'))

    def bn(x, p):
        g, b, m, v = p
        return ((x - m[None, :, None, None])
                / jnp.sqrt(v[None, :, None, None] + BN_EPS)
                * g[None, :, None, None] + b[None, :, None, None])

    out = jax.nn.relu(bn(conv(x, conv1_w, 0), bn1))
    out = jax.nn.relu(bn(conv(out, conv2_w, 1), bn2))
    out = bn(conv(out, conv3_w, 0), bn3)
    return jax.nn.relu(out + x)


if __name__ == "__main__":
    key = jax.random.PRNGKey(0)
    kx, kp = jax.random.split(key)

    # Small shapes: batch=2, planes=4 (inplanes = 16), spatial 16x16.
    N, planes, H, W = 2, 4, 16, 16
    inplanes = planes * EXPANSION
    x = jax.random.normal(kx, (N, inplanes, H, W), jnp.float32)

    conv1_w, conv2_w, conv3_w, bn1, bn2, bn3 = init_params(kp, inplanes, planes)
    params = prepare_params(conv1_w, conv2_w, conv3_w, bn1, bn2, bn3)
    ref = reference(x, conv1_w, conv2_w, conv3_w, bn1, bn2, bn3)

    # Config 1: row_block=8, batch_block=1 -> grid (2, 2); exercises the halo
    # rows, the pl.when border zeroing, and the multi-step pipeline.
    out1 = bottleneck_forward(x, params, row_block=8, batch_block=1)
    jax.block_until_ready(out1)
    err1 = float(jnp.max(jnp.abs(out1.astype(jnp.float32) - ref)))
    assert jnp.allclose(out1.astype(jnp.float32), ref, atol=1.5e-1, rtol=5e-2), \
        f"config1 max abs err = {err1}"

    # Config 2: auto tiling (batch-blocked, single row block).
    out2 = bottleneck_forward(x, params)
    jax.block_until_ready(out2)
    err2 = float(jnp.max(jnp.abs(out2.astype(jnp.float32) - ref)))
    assert jnp.allclose(out2.astype(jnp.float32), ref, atol=1.5e-1, rtol=5e-2), \
        f"config2 max abs err = {err2}"

    print("KERNEL_OK")
</pallas_src>

<mosaic_0001>
module attributes {stable_mosaic.version = 11 : i64} {
  func.func @_bottleneck_kernel(%arg0: i32, %arg1: i32, %arg2: memref<1x8x16x16xbf16, #tpu.memory_space<vmem>>, %arg3: memref<1x1x16x16xbf16, #tpu.memory_space<vmem>>, %arg4: memref<1x1x16x16xbf16, #tpu.memory_space<vmem>>, %arg5: memref<16x4xbf16, #tpu.memory_space<vmem>>, %arg6: memref<1x4xf32, #tpu.memory_space<vmem>>, %arg7: memref<9x4x4xbf16, #tpu.memory_space<vmem>>, %arg8: memref<1x4xf32, #tpu.memory_space<vmem>>, %arg9: memref<4x16xbf16, #tpu.memory_space<vmem>>, %arg10: memref<1x16xf32, #tpu.memory_space<vmem>>, %arg11: memref<1x8x16x16xbf16, #tpu.memory_space<vmem>>, %arg12: memref<3x10x16x4xbf16, #tpu.memory_space<vmem>>) attributes {dimension_semantics = [#tpu.dimension_semantics<parallel>, #tpu.dimension_semantics<parallel>], iteration_bounds = array<i64: 2, 2>, scalar_prefetch = 0 : i64, scratch_operands = 1 : i64, tpu.core_type = #tpu.core_type<tc>, window_params = [{transform_indices = @transform_0, window_bounds = array<i64: 1, 8, 16, 16>}, {transform_indices = @transform_1, window_bounds = array<i64: 1, 1, 16, 16>}, {transform_indices = @transform_2, window_bounds = array<i64: 1, 1, 16, 16>}, {pipeline_mode = #tpu.pipeline_mode<synchronous>, transform_indices = @transform_3, window_bounds = array<i64: 16, 4>}, {pipeline_mode = #tpu.pipeline_mode<synchronous>, transform_indices = @transform_4, window_bounds = array<i64: 1, 4>}, {pipeline_mode = #tpu.pipeline_mode<synchronous>, transform_indices = @transform_5, window_bounds = array<i64: 9, 4, 4>}, {pipeline_mode = #tpu.pipeline_mode<synchronous>, transform_indices = @transform_6, window_bounds = array<i64: 1, 4>}, {pipeline_mode = #tpu.pipeline_mode<synchronous>, transform_indices = @transform_7, window_bounds = array<i64: 4, 16>}, {pipeline_mode = #tpu.pipeline_mode<synchronous>, transform_indices = @transform_8, window_bounds = array<i64: 1, 16>}, {transform_indices = @transform_9, window_bounds = array<i64: 1, 8, 16, 16>}]} {
    %c0 = arith.constant 0 : index
    %c0_0 = arith.constant 0 : index
    %c0_1 = arith.constant 0 : index
    %c0_2 = arith.constant 0 : index
    %0 = vector.load %arg2[%c0, %c0_0, %c0_1, %c0_2] : memref<1x8x16x16xbf16, #tpu.memory_space<vmem>>, vector<1x8x16x16xbf16>
    %1 = vector.shape_cast %0 : vector<1x8x16x16xbf16> to vector<128x16xbf16>
    %c0_3 = arith.constant 0 : index
    %c0_4 = arith.constant 0 : index
    %2 = vector.load %arg5[%c0_3, %c0_4] : memref<16x4xbf16, #tpu.memory_space<vmem>>, vector<16x4xbf16>
    %cst = arith.constant dense<0.000000e+00> : vector<128x4xf32>
    %3 = tpu.matmul %1, %2, %cst {dimension_numbers = #tpu.dot_dimension_numbers<[1], [0], [0], [1], [0, 0, 1, 1], [], []>} : vector<128x16xbf16>, vector<16x4xbf16>, vector<128x4xf32> -> vector<128x4xf32>
    %c0_5 = arith.constant 0 : index
    %c0_6 = arith.constant 0 : index
    %4 = vector.load %arg6[%c0_5, %c0_6] : memref<1x4xf32, #tpu.memory_space<vmem>>, vector<1x4xf32>
    %5 = vector.broadcast %4 : vector<1x4xf32> to vector<128x4xf32>
    %6 = arith.addf %3, %5 : vector<128x4xf32>
    %cst_7 = arith.constant 0.000000e+00 : f32
    %7 = vector.broadcast %cst_7 : f32 to vector<128x4xf32>
    %8 = arith.maximumf %6, %7 : vector<128x4xf32>
    %9 = arith.truncf %8 : vector<128x4xf32> to vector<128x4xbf16>
    %10 = vector.shape_cast %9 : vector<128x4xbf16> to vector<1x8x16x4xbf16>
    %c0_8 = arith.constant 0 : index
    %c0_9 = arith.constant 0 : index
    %c0_10 = arith.constant 0 : index
    %c0_11 = arith.constant 0 : index
    %11 = vector.load %arg3[%c0_8, %c0_9, %c0_10, %c0_11] : memref<1x1x16x16xbf16, #tpu.memory_space<vmem>>, vector<1x1x16x16xbf16>
    %12 = vector.shape_cast %11 : vector<1x1x16x16xbf16> to vector<16x16xbf16>
    %c0_12 = arith.constant 0 : index
    %c0_13 = arith.constant 0 : index
    %13 = vector.load %arg5[%c0_12, %c0_13] : memref<16x4xbf16, #tpu.memory_space<vmem>>, vector<16x4xbf16>
    %cst_14 = arith.constant dense<0.000000e+00> : vector<16x4xf32>
    %14 = tpu.matmul %12, %13, %cst_14 {dimension_numbers = #tpu.dot_dimension_numbers<[1], [0], [0], [1], [0, 0, 1, 1], [], []>} : vector<16x16xbf16>, vector<16x4xbf16>, vector<16x4xf32> -> vector<16x4xf32>
    %c0_15 = arith.constant 0 : index
    %c0_16 = arith.constant 0 : index
    %15 = vector.load %arg6[%c0_15, %c0_16] : memref<1x4xf32, #tpu.memory_space<vmem>>, vector<1x4xf32>
    %16 = vector.broadcast %15 : vector<1x4xf32> to vector<16x4xf32>
    %17 = arith.addf %14, %16 : vector<16x4xf32>
    %cst_17 = arith.constant 0.000000e+00 : f32
    %18 = vector.broadcast %cst_17 : f32 to vector<16x4xf32>
    %19 = arith.maximumf %17, %18 : vector<16x4xf32>
    %20 = arith.truncf %19 : vector<16x4xf32> to vector<16x4xbf16>
    %21 = vector.shape_cast %20 : vector<16x4xbf16> to vector<1x1x16x4xbf16>
    %c0_18 = arith.constant 0 : index
    %c0_19 = arith.constant 0 : index
    %c0_20 = arith.constant 0 : index
    %c0_21 = arith.constant 0 : index
    %22 = vector.load %arg4[%c0_18, %c0_19, %c0_20, %c0_21] : memref<1x1x16x16xbf16, #tpu.memory_space<vmem>>, vector<1x1x16x16xbf16>
    %23 = vector.shape_cast %22 : vector<1x1x16x16xbf16> to vector<16x16xbf16>
    %c0_22 = arith.constant 0 : index
    %c0_23 = arith.constant 0 : index
    %24 = vector.load %arg5[%c0_22, %c0_23] : memref<16x4xbf16, #tpu.memory_space<vmem>>, vector<16x4xbf16>
    %cst_24 = arith.constant dense<0.000000e+00> : vector<16x4xf32>
    %25 = tpu.matmul %23, %24, %cst_24 {dimension_numbers = #tpu.dot_dimension_numbers<[1], [0], [0], [1], [0, 0, 1, 1], [], []>} : vector<16x16xbf16>, vector<16x4xbf16>, vector<16x4xf32> -> vector<16x4xf32>
    %c0_25 = arith.constant 0 : index
    %c0_26 = arith.constant 0 : index
    %26 = vector.load %arg6[%c0_25, %c0_26] : memref<1x4xf32, #tpu.memory_space<vmem>>, vector<1x4xf32>
    %27 = vector.broadcast %26 : vector<1x4xf32> to vector<16x4xf32>
    %28 = arith.addf %25, %27 : vector<16x4xf32>
    %cst_27 = arith.constant 0.000000e+00 : f32
    %29 = vector.broadcast %cst_27 : f32 to vector<16x4xf32>
    %30 = arith.maximumf %28, %29 : vector<16x4xf32>
    %31 = arith.truncf %30 : vector<16x4xf32> to vector<16x4xbf16>
    %32 = vector.shape_cast %31 : vector<16x4xbf16> to vector<1x1x16x4xbf16>
    %33 = tpu.concatenate %21, %10, %32 in 1 : vector<1x1x16x4xbf16>, vector<1x8x16x4xbf16>, vector<1x1x16x4xbf16> -> vector<1x10x16x4xbf16>
    %cst_28 = arith.constant 0.000000e+00 : bf16
    %34 = vector.broadcast %cst_28 : bf16 to vector<1x10x1x4xbf16>
    %35 = vector.extract_strided_slice %33 {offsets = [0, 0, 0, 0], sizes = [1, 10, 15, 4], strides = [1, 1, 1, 1]} : vector<1x10x16x4xbf16> to vector<1x10x15x4xbf16>
    %36 = tpu.concatenate %34, %35 in 2 : vector<1x10x1x4xbf16>, vector<1x10x15x4xbf16> -> vector<1x10x16x4xbf16>
    %c0_29 = arith.constant 0 : index
    %c0_30 = arith.constant 0 : index
    %c0_31 = arith.constant 0 : index
    %c0_32 = arith.constant 0 : index
    %37 = vector.load %arg12[%c0_29, %c0_30, %c0_31, %c0_32] : memref<3x10x16x4xbf16, #tpu.memory_space<vmem>>, vector<1x10x16x4xbf16>
    tpu.vector_store %arg12[%c0_29, %c0_30, %c0_31, %c0_32], %36 {strides = array<i32>} : memref<3x10x16x4xbf16, #tpu.memory_space<vmem>>, vector<1x10x16x4xbf16>,
    %c1 = arith.constant 1 : index
    %c0_33 = arith.constant 0 : index
    %c0_34 = arith.constant 0 : index
    %c0_35 = arith.constant 0 : index
    %38 = vector.load %arg12[%c1, %c0_33, %c0_34, %c0_35] : memref<3x10x16x4xbf16, #tpu.memory_space<vmem>>, vector<1x10x16x4xbf16>
    tpu.vector_store %arg12[%c1, %c0_33, %c0_34, %c0_35], %33 {strides = array<i32>} : memref<3x10x16x4xbf16, #tpu.memory_space<vmem>>, vector<1x10x16x4xbf16>,
    %39 = vector.extract_strided_slice %33 {offsets = [0, 0, 1, 0], sizes = [1, 10, 15, 4], strides = [1, 1, 1, 1]} : vector<1x10x16x4xbf16> to vector<1x10x15x4xbf16>
    %40 = tpu.concatenate %39, %34 in 2 : vector<1x10x15x4xbf16>, vector<1x10x1x4xbf16> -> vector<1x10x16x4xbf16>
    %c2 = arith.constant 2 : index
    %c0_36 = arith.constant 0 : index
    %c0_37 = arith.constant 0 : index
    %c0_38 = arith.constant 0 : index
    %41 = vector.load %arg12[%c2, %c0_36, %c0_37, %c0_38] : memref<3x10x16x4xbf16, #tpu.memory_space<vmem>>, vector<1x10x16x4xbf16>
    tpu.vector_store %arg12[%c2, %c0_36, %c0_37, %c0_38], %40 {strides = array<i32>} : memref<3x10x16x4xbf16, #tpu.memory_space<vmem>>, vector<1x10x16x4xbf16>,
    %c0_i32 = arith.constant 0 : i32
    %42 = arith.cmpi eq, %arg1, %c0_i32 : i32
    %43 = arith.extui %42 : i1 to i32
    %c0_i32_39 = arith.constant 0 : i32
    %44 = arith.cmpi ne, %43, %c0_i32_39 : i32
    scf.if %44 {
      %cst_124 = arith.constant 0.000000e+00 : bf16
      %121 = vector.broadcast %cst_124 : bf16 to vector<3x1x16x4xbf16>
      %c0_125 = arith.constant 0 : index
      %c0_126 = arith.constant 0 : index
      %c0_127 = arith.constant 0 : index
      %c0_128 = arith.constant 0 : index
      %122 = vector.load %arg12[%c0_125, %c0_126, %c0_127, %c0_128] : memref<3x10x16x4xbf16, #tpu.memory_space<vmem>>, vector<3x1x16x4xbf16>
      tpu.vector_store %arg12[%c0_125, %c0_126, %c0_127, %c0_128], %121 {strides = array<i32>} : memref<3x10x16x4xbf16, #tpu.memory_space<vmem>>, vector<3x1x16x4xbf16>,
    } else {
    }
    %c1_i32 = arith.constant 1 : i32
    %45 = arith.cmpi eq, %arg1, %c1_i32 : i32
    %46 = arith.extui %45 : i1 to i32
    %c0_i32_40 = arith.constant 0 : i32
    %47 = arith.cmpi ne, %46, %c0_i32_40 : i32
    scf.if %47 {
      %cst_124 = arith.constant 0.000000e+00 : bf16
      %121 = vector.broadcast %cst_124 : bf16 to vector<3x1x16x4xbf16>
      %c0_125 = arith.constant 0 : index
      %c9 = arith.constant 9 : index
      %c0_126 = arith.constant 0 : index
      %c0_127 = arith.constant 0 : index
      %122 = vector.load %arg12[%c0_125, %c9, %c0_126, %c0_127] : memref<3x10x16x4xbf16, #tpu.memory_space<vmem>>, vector<3x1x16x4xbf16>
      tpu.vector_store %arg12[%c0_125, %c9, %c0_126, %c0_127], %121 {strides = array<i32>} : memref<3x10x16x4xbf16, #tpu.memory_space<vmem>>, vector<3x1x16x4xbf16>,
    } else {
    }
    %c0_41 = arith.constant 0 : index
    %c0_42 = arith.constant 0 : index
    %c0_43 = arith.constant 0 : index
    %c0_44 = arith.constant 0 : index
    %48 = vector.load %arg12[%c0_41, %c0_42, %c0_43, %c0_44] : memref<3x10x16x4xbf16, #tpu.memory_space<vmem>>, vector<1x8x16x4xbf16>
    %49 = vector.shape_cast %48 : vector<1x8x16x4xbf16> to vector<128x4xbf16>
    %c0_45 = arith.constant 0 : index
    %c0_46 = arith.constant 0 : index
    %c0_47 = arith.constant 0 : index
    %50 = vector.load %arg7[%c0_45, %c0_46, %c0_47] : memref<9x4x4xbf16, #tpu.memory_space<vmem>>, vector<1x4x4xbf16>
    %51 = vector.shape_cast %50 : vector<1x4x4xbf16> to vector<4x4xbf16>
    %cst_48 = arith.constant dense<0.000000e+00> : vector<128x4xf32>
    %52 = tpu.matmul %49, %51, %cst_48 {dimension_numbers = #tpu.dot_dimension_numbers<[1], [0], [0], [1], [0, 0, 1, 1], [], []>} : vector<128x4xbf16>, vector<4x4xbf16>, vector<128x4xf32> -> vector<128x4xf32>
    %c1_49 = arith.constant 1 : index
    %c0_50 = arith.constant 0 : index
    %c0_51 = arith.constant 0 : index
    %c0_52 = arith.constant 0 : index
    %53 = vector.load %arg12[%c1_49, %c0_50, %c0_51, %c0_52] : memref<3x10x16x4xbf16, #tpu.memory_space<vmem>>, vector<1x8x16x4xbf16>
    %54 = vector.shape_cast %53 : vector<1x8x16x4xbf16> to vector<128x4xbf16>
    %c1_53 = arith.constant 1 : index
    %c0_54 = arith.constant 0 : index
    %c0_55 = arith.constant 0 : index
    %55 = vector.load %arg7[%c1_53, %c0_54, %c0_55] : memref<9x4x4xbf16, #tpu.memory_space<vmem>>, vector<1x4x4xbf16>
    %56 = vector.shape_cast %55 : vector<1x4x4xbf16> to vector<4x4xbf16>
    %cst_56 = arith.constant dense<0.000000e+00> : vector<128x4xf32>
    %57 = tpu.matmul %54, %56, %cst_56 {dimension_numbers = #tpu.dot_dimension_numbers<[1], [0], [0], [1], [0, 0, 1, 1], [], []>} : vector<128x4xbf16>, vector<4x4xbf16>, vector<128x4xf32> -> vector<128x4xf32>
    %58 = arith.addf %52, %57 : vector<128x4xf32>
    %c2_57 = arith.constant 2 : index
    %c0_58 = arith.constant 0 : index
    %c0_59 = arith.constant 0 : index
    %c0_60 = arith.constant 0 : index
    %59 = vector.load %arg12[%c2_57, %c0_58, %c0_59, %c0_60] : memref<3x10x16x4xbf16, #tpu.memory_space<vmem>>, vector<1x8x16x4xbf16>
    %60 = vector.shape_cast %59 : vector<1x8x16x4xbf16> to vector<128x4xbf16>
    %c2_61 = arith.constant 2 : index
    %c0_62 = arith.constant 0 : index
    %c0_63 = arith.constant 0 : index
    %61 = vector.load %arg7[%c2_61, %c0_62, %c0_63] : memref<9x4x4xbf16, #tpu.memory_space<vmem>>, vector<1x4x4xbf16>
    %62 = vector.shape_cast %61 : vector<1x4x4xbf16> to vector<4x4xbf16>
    %cst_64 = arith.constant dense<0.000000e+00> : vector<128x4xf32>
    %63 = tpu.matmul %60, %62, %cst_64 {dimension_numbers = #tpu.dot_dimension_numbers<[1], [0], [0], [1], [0, 0, 1, 1], [], []>} : vector<128x4xbf16>, vector<4x4xbf16>, vector<128x4xf32> -> vector<128x4xf32>
    %64 = arith.addf %58, %63 : vector<128x4xf32>
    %c0_65 = arith.constant 0 : index
    %c1_66 = arith.constant 1 : index
    %c0_67 = arith.constant 0 : index
    %c0_68 = arith.constant 0 : index
    %65 = vector.load %arg12[%c0_65, %c1_66, %c0_67, %c0_68] : memref<3x10x16x4xbf16, #tpu.memory_space<vmem>>, vector<1x8x16x4xbf16>
    %66 = vector.shape_cast %65 : vector<1x8x16x4xbf16> to vector<128x4xbf16>
    %c3 = arith.constant 3 : index
    %c0_69 = arith.constant 0 : index
    %c0_70 = arith.constant 0 : index
    %67 = vector.load %arg7[%c3, %c0_69, %c0_70] : memref<9x4x4xbf16, #tpu.memory_space<vmem>>, vector<1x4x4xbf16>
    %68 = vector.shape_cast %67 : vector<1x4x4xbf16> to vector<4x4xbf16>
    %cst_71 = arith.constant dense<0.000000e+00> : vector<128x4xf32>
    %69 = tpu.matmul %66, %68, %cst_71 {dimension_numbers = #tpu.dot_dimension_numbers<[1], [0], [0], [1], [0, 0, 1, 1], [], []>} : vector<128x4xbf16>, vector<4x4xbf16>, vector<128x4xf32> -> vector<128x4xf32>
    %70 = arith.addf %64, %69 : vector<128x4xf32>
    %c1_72 = arith.constant 1 : index
    %c1_73 = arith.constant 1 : index
    %c0_74 = arith.constant 0 : index
    %c0_75 = arith.constant 0 : index
    %71 = vector.load %arg12[%c1_72, %c1_73, %c0_74, %c0_75] : memref<3x10x16x4xbf16, #tpu.memory_space<vmem>>, vector<1x8x16x4xbf16>
    %72 = vector.shape_cast %71 : vector<1x8x16x4xbf16> to vector<128x4xbf16>
    %c4 = arith.constant 4 : index
    %c0_76 = arith.constant 0 : index
    %c0_77 = arith.constant 0 : index
    %73 = vector.load %arg7[%c4, %c0_76, %c0_77] : memref<9x4x4xbf16, #tpu.memory_space<vmem>>, vector<1x4x4xbf16>
    %74 = vector.shape_cast %73 : vector<1x4x4xbf16> to vector<4x4xbf16>
    %cst_78 = arith.constant dense<0.000000e+00> : vector<128x4xf32>
    %75 = tpu.matmul %72, %74, %cst_78 {dimension_numbers = #tpu.dot_dimension_numbers<[1], [0], [0], [1], [0, 0, 1, 1], [], []>} : vector<128x4xbf16>, vector<4x4xbf16>, vector<128x4xf32> -> vector<128x4xf32>
    %76 = arith.addf %70, %75 : vector<128x4xf32>
    %c2_79 = arith.constant 2 : index
    %c1_80 = arith.constant 1 : index
    %c0_81 = arith.constant 0 : index
    %c0_82 = arith.constant 0 : index
    %77 = vector.load %arg12[%c2_79, %c1_80, %c0_81, %c0_82] : memref<3x10x16x4xbf16, #tpu.memory_space<vmem>>, vector<1x8x16x4xbf16>
    %78 = vector.shape_cast %77 : vector<1x8x16x4xbf16> to vector<128x4xbf16>
    %c5 = arith.constant 5 : index
    %c0_83 = arith.constant 0 : index
    %c0_84 = arith.constant 0 : index
    %79 = vector.load %arg7[%c5, %c0_83, %c0_84] : memref<9x4x4xbf16, #tpu.memory_space<vmem>>, vector<1x4x4xbf16>
    %80 = vector.shape_cast %79 : vector<1x4x4xbf16> to vector<4x4xbf16>
    %cst_85 = arith.constant dense<0.000000e+00> : vector<128x4xf32>
    %81 = tpu.matmul %78, %80, %cst_85 {dimension_numbers = #tpu.dot_dimension_numbers<[1], [0], [0], [1], [0, 0, 1, 1], [], []>} : vector<128x4xbf16>, vector<4x4xbf16>, vector<128x4xf32> -> vector<128x4xf32>
    %82 = arith.addf %76, %81 : vector<128x4xf32>
    %c0_86 = arith.constant 0 : index
    %c2_87 = arith.constant 2 : index
    %c0_88 = arith.constant 0 : index
    %c0_89 = arith.constant 0 : index
    %83 = vector.load %arg12[%c0_86, %c2_87, %c0_88, %c0_89] : memref<3x10x16x4xbf16, #tpu.memory_space<vmem>>, vector<1x8x16x4xbf16>
    %84 = vector.shape_cast %83 : vector<1x8x16x4xbf16> to vector<128x4xbf16>
    %c6 = arith.constant 6 : index
    %c0_90 = arith.constant 0 : index
    %c0_91 = arith.constant 0 : index
    %85 = vector.load %arg7[%c6, %c0_90, %c0_91] : memref<9x4x4xbf16, #tpu.memory_space<vmem>>, vector<1x4x4xbf16>
    %86 = vector.shape_cast %85 : vector<1x4x4xbf16> to vector<4x4xbf16>
    %cst_92 = arith.constant dense<0.000000e+00> : vector<128x4xf32>
    %87 = tpu.matmul %84, %86, %cst_92 {dimension_numbers = #tpu.dot_dimension_numbers<[1], [0], [0], [1], [0, 0, 1, 1], [], []>} : vector<128x4xbf16>, vector<4x4xbf16>, vector<128x4xf32> -> vector<128x4xf32>
    %88 = arith.addf %82, %87 : vector<128x4xf32>
    %c1_93 = arith.constant 1 : index
    %c2_94 = arith.constant 2 : index
    %c0_95 = arith.constant 0 : index
    %c0_96 = arith.constant 0 : index
    %89 = vector.load %arg12[%c1_93, %c2_94, %c0_95, %c0_96] : memref<3x10x16x4xbf16, #tpu.memory_space<vmem>>, vector<1x8x16x4xbf16>
    %90 = vector.shape_cast %89 : vector<1x8x16x4xbf16> to vector<128x4xbf16>
    %c7 = arith.constant 7 : index
    %c0_97 = arith.constant 0 : index
    %c0_98 = arith.constant 0 : index
    %91 = vector.load %arg7[%c7, %c0_97, %c0_98] : memref<9x4x4xbf16, #tpu.memory_space<vmem>>, vector<1x4x4xbf16>
    %92 = vector.shape_cast %91 : vector<1x4x4xbf16> to vector<4x4xbf16>
    %cst_99 = arith.constant dense<0.000000e+00> : vector<128x4xf32>
    %93 = tpu.matmul %90, %92, %cst_99 {dimension_numbers = #tpu.dot_dimension_numbers<[1], [0], [0], [1], [0, 0, 1, 1], [], []>} : vector<128x4xbf16>, vector<4x4xbf16>, vector<128x4xf32> -> vector<128x4xf32>
    %94 = arith.addf %88, %93 : vector<128x4xf32>
    %c2_100 = arith.constant 2 : index
    %c2_101 = arith.constant 2 : index
    %c0_102 = arith.constant 0 : index
    %c0_103 = arith.constant 0 : index
    %95 = vector.load %arg12[%c2_100, %c2_101, %c0_102, %c0_103] : memref<3x10x16x4xbf16, #tpu.memory_space<vmem>>, vector<1x8x16x4xbf16>
    %96 = vector.shape_cast %95 : vector<1x8x16x4xbf16> to vector<128x4xbf16>
    %c8 = arith.constant 8 : index
    %c0_104 = arith.constant 0 : index
    %c0_105 = arith.constant 0 : index
    %97 = vector.load %arg7[%c8, %c0_104, %c0_105] : memref<9x4x4xbf16, #tpu.memory_space<vmem>>, vector<1x4x4xbf16>
    %98 = vector.shape_cast %97 : vector<1x4x4xbf16> to vector<4x4xbf16>
    %cst_106 = arith.constant dense<0.000000e+00> : vector<128x4xf32>
    %99 = tpu.matmul %96, %98, %cst_106 {dimension_numbers = #tpu.dot_dimension_numbers<[1], [0], [0], [1], [0, 0, 1, 1], [], []>} : vector<128x4xbf16>, vector<4x4xbf16>, vector<128x4xf32> -> vector<128x4xf32>
    %100 = arith.addf %94, %99 : vector<128x4xf32>
    %c0_107 = arith.constant 0 : index
    %c0_108 = arith.constant 0 : index
    %101 = vector.load %arg8[%c0_107, %c0_108] : memref<1x4xf32, #tpu.memory_space<vmem>>, vector<1x4xf32>
    %102 = vector.broadcast %101 : vector<1x4xf32> to vector<128x4xf32>
    %103 = arith.addf %100, %102 : vector<128x4xf32>
    %cst_109 = arith.constant 0.000000e+00 : f32
    %104 = vector.broadcast %cst_109 : f32 to vector<128x4xf32>
    %105 = arith.maximumf %103, %104 : vector<128x4xf32>
    %106 = arith.truncf %105 : vector<128x4xf32> to vector<128x4xbf16>
    %c0_110 = arith.constant 0 : index
    %c0_111 = arith.constant 0 : index
    %107 = vector.load %arg9[%c0_110, %c0_111] : memref<4x16xbf16, #tpu.memory_space<vmem>>, vector<4x16xbf16>
    %cst_112 = arith.constant dense<0.000000e+00> : vector<128x16xf32>
    %108 = tpu.matmul %106, %107, %cst_112 {dimension_numbers = #tpu.dot_dimension_numbers<[1], [0], [0], [1], [0, 0, 1, 1], [], []>} : vector<128x4xbf16>, vector<4x16xbf16>, vector<128x16xf32> -> vector<128x16xf32>
    %c0_113 = arith.constant 0 : index
    %c0_114 = arith.constant 0 : index
    %109 = vector.load %arg10[%c0_113, %c0_114] : memref<1x16xf32, #tpu.memory_space<vmem>>, vector<1x16xf32>
    %110 = vector.broadcast %109 : vector<1x16xf32> to vector<128x16xf32>
    %111 = arith.addf %108, %110 : vector<128x16xf32>
    %c0_115 = arith.constant 0 : index
    %c0_116 = arith.constant 0 : index
    %c0_117 = arith.constant 0 : index
    %c0_118 = arith.constant 0 : index
    %112 = vector.load %arg2[%c0_115, %c0_116, %c0_117, %c0_118] : memref<1x8x16x16xbf16, #tpu.memory_space<vmem>>, vector<1x8x16x16xbf16>
    %113 = vector.shape_cast %112 : vector<1x8x16x16xbf16> to vector<128x16xbf16>
    %114 = arith.extf %113 : vector<128x16xbf16> to vector<128x16xf32>
    %115 = arith.addf %111, %114 : vector<128x16xf32>
    %cst_119 = arith.constant 0.000000e+00 : f32
    %116 = vector.broadcast %cst_119 : f32 to vector<128x16xf32>
    %117 = arith.maximumf %115, %116 : vector<128x16xf32>
    %118 = vector.shape_cast %117 : vector<128x16xf32> to vector<1x8x16x16xf32>
    %119 = arith.truncf %118 : vector<1x8x16x16xf32> to vector<1x8x16x16xbf16>
    %c0_120 = arith.constant 0 : index
    %c0_121 = arith.constant 0 : index
    %c0_122 = arith.constant 0 : index
    %c0_123 = arith.constant 0 : index
    %120 = vector.load %arg11[%c0_120, %c0_121, %c0_122, %c0_123] : memref<1x8x16x16xbf16, #tpu.memory_space<vmem>>, vector<1x8x16x16xbf16>
    tpu.vector_store %arg11[%c0_120, %c0_121, %c0_122, %c0_123], %119 {strides = array<i32>} : memref<1x8x16x16xbf16, #tpu.memory_space<vmem>>, vector<1x8x16x16xbf16>,
    return
  }
  func.func @transform_0(%arg0: i32, %arg1: i32) -> (i32, i32, i32, i32) {
    %c0_i32 = arith.constant 0 : i32
    %c0_i32_0 = arith.constant 0 : i32
    %c0_i32_1 = arith.constant 0 : i32
    return %arg0, %arg1, %c0_i32, %c0_i32_0 : i32, i32, i32, i32
  }
  func.func @transform_1(%arg0: i32, %arg1: i32) -> (i32, i32, i32, i32) {
    %c0_i32 = arith.constant 0 : i32
    %c0_i32_0 = arith.constant 0 : i32
    %c0_i32_1 = arith.constant 0 : i32
    return %arg0, %arg1, %c0_i32, %c0_i32_0 : i32, i32, i32, i32
  }
  func.func @transform_2(%arg0: i32, %arg1: i32) -> (i32, i32, i32, i32) {
    %c0_i32 = arith.constant 0 : i32
    %c0_i32_0 = arith.constant 0 : i32
    %c0_i32_1 = arith.constant 0 : i32
    return %arg0, %arg1, %c0_i32, %c0_i32_0 : i32, i32, i32, i32
  }
  func.func @transform_3(%arg0: i32, %arg1: i32) -> (i32, i32) {
    %c0_i32 = arith.constant 0 : i32
    %c0_i32_0 = arith.constant 0 : i32
    %c0_i32_1 = arith.constant 0 : i32
    return %c0_i32, %c0_i32_0 : i32, i32
  }
  func.func @transform_4(%arg0: i32, %arg1: i32) -> (i32, i32) {
    %c0_i32 = arith.constant 0 : i32
    %c0_i32_0 = arith.constant 0 : i32
    %c0_i32_1 = arith.constant 0 : i32
    return %c0_i32, %c0_i32_0 : i32, i32
  }
  func.func @transform_5(%arg0: i32, %arg1: i32) -> (i32, i32, i32) {
    %c0_i32 = arith.constant 0 : i32
    %c0_i32_0 = arith.constant 0 : i32
    %c0_i32_1 = arith.constant 0 : i32
    %c0_i32_2 = arith.constant 0 : i32
    return %c0_i32, %c0_i32_0, %c0_i32_1 : i32, i32, i32
  }
  func.func @transform_6(%arg0: i32, %arg1: i32) -> (i32, i32) {
    %c0_i32 = arith.constant 0 : i32
    %c0_i32_0 = arith.constant 0 : i32
    %c0_i32_1 = arith.constant 0 : i32
    return %c0_i32, %c0_i32_0 : i32, i32
  }
  func.func @transform_7(%arg0: i32, %arg1: i32) -> (i32, i32) {
    %c0_i32 = arith.constant 0 : i32
    %c0_i32_0 = arith.constant 0 : i32
    %c0_i32_1 = arith.constant 0 : i32
    return %c0_i32, %c0_i32_0 : i32, i32
  }
  func.func @transform_8(%arg0: i32, %arg1: i32) -> (i32, i32) {
    %c0_i32 = arith.constant 0 : i32
    %c0_i32_0 = arith.constant 0 : i32
    %c0_i32_1 = arith.constant 0 : i32
    return %c0_i32, %c0_i32_0 : i32, i32
  }
  func.func @transform_9(%arg0: i32, %arg1: i32) -> (i32, i32, i32, i32) {
    %c0_i32 = arith.constant 0 : i32
    %c0_i32_0 = arith.constant 0 : i32
    %c0_i32_1 = arith.constant 0 : i32
    return %arg0, %arg1, %c0_i32, %c0_i32_0 : i32, i32, i32, i32
  }
}

</mosaic_0001>

<bundles_post_ra>
// kernel: bottleneck_forward.1
= control target key start
LH: loop header
LB: loop body
LE: loop exit
PB: predicated region body
PF: predicated region fallthrough
CT: control target
= control target key end

     0   :  { %s3489_s30 = smov 0   ;;  %s3491_s10 = smov 0   ;;  %s4057_s0 = inlined_call_operand.vmem [shape: bf16[2,16,16,16], index: 0, kind: input, shape index: {}]   ;;  %s4058_s1 = inlined_call_operand.vmem [shape: bf16[2,2,16,16], index: 1, kind: input, shape index: {}]   ;;  %s4059_s2 = inlined_call_operand.vmem [shape: bf16[2,2,16,16], index: 2, kind: input, shape index: {}]   ;;  %s4060_s3 = inlined_call_operand.vmem [shape: bf16[16,4], index: 3, kind: input, shape index: {}]   ;;  %s4061_s4 = inlined_call_operand.vmem [shape: f32[1,4], index: 4, kind: input, shape index: {}]   ;;  %s4062_s5 = inlined_call_operand.vmem [shape: bf16[9,4,4], index: 5, kind: input, shape index: {}]   ;;  %s4063_s6 = inlined_call_operand.vmem [shape: f32[1,4], index: 6, kind: input, shape index: {}]   ;;  %s4064_s7 = inlined_call_operand.vmem [shape: bf16[4,16], index: 7, kind: input, shape index: {}]   ;;  %s4065_s8 = inlined_call_operand.vmem [shape: f32[1,16], index: 8, kind: input, shape index: {}]   ;;  %s4066_s9 = inlined_call_operand.vmem [shape: bf16[2,16,16,16], index: 9, kind: output, shape index: {}]  }
   0x1   :  { %s3493_s11 = smov 0   ;;  %s3495_s12 = smov 0  }
   0x2   :  { %s3497_s13 = smov 0  }
   0x3 LB: > { %s28_s14 = sadd.s32 1, %s3427_s11  ;;  %s31_s15 = sadd.s32 1, %s3431_s12  ;;  %s3435_s13 = sphi %s3497_s13, %s19_s13   ;;  %s3431_s12 = sphi %s3495_s12, %s4074_s12   ;;  %s3427_s11 = sphi %s3493_s11, %s4073_s11   ;;  %s3423_s10 = sphi %s3491_s10, %s4072_s10   ;;  %s3419_s30 = sphi %s3489_s30, %s4071_s30  }
   0x4   : > { %p29_p0 = scmp.ge.s32.totalorder %s28_s14, 2  ;;  %p2778_p1 = scmp.ge.s32.totalorder %s3435_s13, 1 }
   0x5   : > { %p341_p2 = scmp.lt.s32.totalorder %s3435_s13, 5 }
   0x6   : > { %s4076_s14 = smov (%p29_p0, %s28_s14), 0  ;;  %s4078_s15 = smov (!%p29_p0, %s31_s15), %s3431_s12 }
   0x7   : > { %p342_p3 = pnand %p2778_p1, %p341_p2  ;;  %p33_p4 = scmp.ge.s32.totalorder %s4078_s15, 2 }
   0x8   : > { %s2779_s18 = sshll.u32 (!%p342_p3), %s3419_s30, 3  ;;  %p406_p5 = scmp.lt.s32.totalorder (!%p342_p3), %s3423_s10, 1 }
   0x9   : > { %s4080_s15 = smov (%p33_p4, %s4078_s15), 0  ;;  %345 = sbr.rel (%p342_p3) target bundleno = 944 (0x3b0), region = 56 }
   0xa   : > { %p408_p6 = scmp.lt.s32.totalorder (!%p342_p3), %s2779_s18, 15  ;;  %p418_p7 = scmp.lt.s32.totalorder (!%p342_p3), %s3419_s30, 1 }
   0xb   : > { %p2847_p8 = scmp.ne.s32.totalorder (!%p342_p3), %s3419_s30, 0 }
   0xe   : > { %v3235_v0 = vld [vmem:[%s4060_s3] sm:$0xff]  ;;  %s4082_s10 = smov (!%p406_p5, %s3423_s10), 1  ;;  %s4084_s18 = smov (!%p408_p6, %s2779_s18), 15  ;;  %vm514_vm0 = vcmask 130048   ;;  %vm889_vm1 = vcmask 27648   ;;  %vm806_vm2 = vcmask 1040384  }
   0xf   : > { %546 = vmatpush.bf16.msra.mxu0 %v3235_v0  ;;  %3349 = vmatpush.bf16.msra.mxu2 %v3235_v0  ;;  %s2781_s19 = sshll.u32 %s4082_s10, 5  ;;  %s2780_s20 = sshll.u32 %s4084_s18, 1  ;;  %v3564_v11 = vld [vmem:[%s4061_s4] ss:$0 sm:$0xff]  ;;  %vm807_vm3 = vsmask.f32 256 }
  0x10   : > { %637 = vmatpush.bf16.msra.mxu1 %v3235_v0  ;;  %s412_s21 = sadd.s32 %s2781_s19, %s2780_s20  ;;  %s2784_s17 = sshll.u32 %s4082_s10, 2  ;;  %vm961_vm4 = vcmask 1047552   ;;  %vm962_vm5 = vsmask.f32 7424  ;;  %vm3571_vm6 = vmand %vm806_vm2, %vm807_vm3 }
  0x11   : > { %s2782_s22 = sshll.u32 %s412_s21, 2  ;;  %vm3575_vm7 = vmand %vm961_vm4, %vm962_vm5 }
  0x12   : > { %s3528_s25 = scalar_lea.vmem %s4057_s0, %s2782_s22  ;;  %s3533_s28 = scalar_lea.vmem %s4066_s9, %s2782_s22 }
  0x13   : > { %665 = vmatpush.bf16.msrb.mxu2 %v3235_v0  ;;  %v3227_v1 = vld [vmem:[%s3528_s25] sm:$0xff]  ;;  %v3228_v2 = vld [vmem:[%s3528_s25 + $0x8] sm:$0xff]  ;;  %v3229_v3 = vld [vmem:[%s3528_s25 + $0x10] sm:$0xff]  ;;  %s419_s29 = scalar_select %p418_p7, %s3419_s30, 1 }
  0x14   : > { %2829 = vmatmul.msk.bf16.vlgmr.msra.gmra.mxu0 %vm514_vm0, %v3227_v1  ;;  %v3234_v4 = vld [vmem:[%s3528_s25 + $0x38] sm:$0xff]  ;;  %v3231_v8 = vld [vmem:[%s3528_s25 + $0x20] sm:$0xff]  ;;  %v3232_v9 = vld [vmem:[%s3528_s25 + $0x28] sm:$0xff] }
  0x15   : > { %2836 = vmatmul.msk.bf16.vlgmr.msra.gmra.mxu2 %vm514_vm0, %v3234_v4  ;;  %s2783_s16 = sshll.u32 %s419_s29, 1  ;;  %v3230_v5 = vld [vmem:[%s3528_s25 + $0x18] sm:$0xff]  ;;  %v3233_v10 = vld [vmem:[%s3528_s25 + $0x30] sm:$0xff] }
  0x16   : > { %s422_s18 = sadd.s32 %s2784_s17, %s2783_s16 }
  0x17   : > { %s2785_s19 = sshll.u32 %s422_s18, 2 }
  0x18   : > { %s433_s22 = scalar_lea.vmem %s4059_s2, %s2785_s19  ;;  %s424_s26 = scalar_lea.vmem %s4058_s1, %s2785_s19 }
  0x19   : > { %v3237_v6 = vld [vmem:[%s433_s22] sm:$0xff] }
  0x1a   : > { %v3236_v7 = vld [vmem:[%s424_s26] sm:$0xff] }
  0x1b   : > { %2841 = vmatmul.msk.bf16.vlgmr.msra.gmra.mxu1 %vm514_vm0, %v3236_v7 }
  0x24   : > { %2830 = vmatmul.msk.bf16.gmra.mxu0 %vm514_vm0, %v3228_v2 }
  0x25   : > { %2846 = vmatmul.msk.bf16.vlgmr.msrb.gmra.mxu2 %vm514_vm0, %v3237_v6 }
  0x34   : > { %2831 = vmatmul.msk.bf16.gmra.mxu0 %vm514_vm0, %v3229_v3 }
  0x44   : > { %2832 = vmatmul.msk.bf16.gmra.mxu0 %vm514_vm0, %v3230_v5 }
  0x54   : > { %2833 = vmatmul.msk.bf16.gmra.mxu0 %vm514_vm0, %v3231_v8 }
  0x64   : > { %2834 = vmatmul.msk.bf16.gmra.mxu0 %vm514_vm0, %v3232_v9 }
  0x74   : > { %2835 = vmatmul.msk.bf16.gmra.mxu0 %vm514_vm0, %v3233_v10 }
  0x91   : > { %v548_v12 = vpop.f32.mrf.mxu0 }
  0x92   : > { %v549_v13 = vadd.f32 %v3564_v11, %v548_v12 }
  0x94   : > { %v588_v14 = vmax.f32 %v549_v13, 0.0 }
  0x96   : > { %v604_v15 = vpack.c.bf16 %v588_v14, %v588_v14 }
  0x98   : > { %913 = vst.msk [vmem:[#allocation2 + $0x58] sm:$0xf] %vm889_vm1, %v604_v15  ;;  %v698_v20 = vunpack.c.l.b16 %v604_v15  ;;  %v583_v2 = vpop.f32.mrf.mxu2 }
  0x99   : > { %v550_v16 = vpop.f32.mrf.mxu0 }
  0x9a   : > { %v551_v17 = vadd.f32 %v3564_v11, %v550_v16 }
  0x9c   : > { %v589_v18 = vmax.f32 %v551_v17, 0.0 }
  0x9e   : > { %v605_v19 = vpack.c.bf16 %v589_v18, %v589_v18 }
  0xa0   : > { %v699_v21 = vunpack.c.l.b16 %v605_v19  ;;  %914 = vst.msk [vmem:[#allocation2 + $0x5c] sm:$0xf] %vm889_vm1, %v605_v19  ;;  %v584_v19 = vadd.f32 %v3564_v11, %v583_v2 }
  0xa1   : > { %v553_v22 = vpop.f32.mrf.mxu0 }
  0xa2   : > { %v717_v23 = vpack.c.b16 %v699_v21, %v698_v20  ;;  %v554_v24 = vadd.f32 %v3564_v11, %v553_v22  ;;  %v585_v20 = vpop.f32.mrf.mxu2 }
  0xa3   : > { %v586_v21 = vadd.f32 %v3564_v11, %v585_v20 }
  0xa4   : > { %v734_v25 = vshrl.u32 %v717_v23, 16  ;;  %v737_v26 = vshll.u32 %v717_v23, 16  ;;  %v590_v27 = vmax.f32 %v554_v24, 0.0 }
  0xa6   : > { %v736_v28 = vrot.slane %v734_v25, 7  ;;  %v933_v30 = vrot.slane %v737_v26, 1  ;;  %v606_v31 = vpack.c.bf16 %v590_v27, %v590_v27 }
  0xa8   : > { %v739_v33 = vor.u32 %v737_v26, %v736_v28  ;;  %v934_v34 = vor.u32 %v933_v30, %v734_v25  ;;  %915 = vst.msk [vmem:[#allocation2 + $0x60] sm:$0xf] %vm889_vm1, %v606_v31  ;;  %v700_v49 = vunpack.c.l.b16 %v606_v31  ;;  %v602_v25 = vmax.f32 %v584_v19, 0.0 }
  0xa9   : > { %v555_v35 = vpop.f32.mrf.mxu0  ;;  %v603_v26 = vmax.f32 %v586_v21, 0.0 }
  0xaa   : > { %v810_v36 = vsel %vm3571_vm6, 0, %v739_v33  ;;  %v965_v37 = vsel %vm3575_vm7, %v934_v34, 0  ;;  %v556_v38 = vadd.f32 %v3564_v11, %v555_v35  ;;  %v618_v31 = vpack.c.bf16 %v602_v25, %v602_v25 }
  0xab   : > { %v831_v39 = vunpack.c.l.b16 %v810_v36  ;;  %v832_v40 = vunpack.c.h.b16 %v810_v36  ;;  %v986_v41 = vunpack.c.l.b16 %v965_v37  ;;  %v987_v42 = vunpack.c.h.b16 %v965_v37 }
  0xac   : > { %v591_v43 = vmax.f32 %v556_v38, 0.0  ;;  %v619_v33 = vpack.c.bf16 %v603_v26, %v603_v26  ;;  %v712_v36 = vunpack.c.l.b16 %v618_v31  ;;  %927 = vst.msk [vmem:[#allocation2 + $0x90] sm:$0xf] %vm889_vm1, %v618_v31 }
  0xad   : > { %v851_v44 = vpack.c.b16 %v831_v39, %v831_v39  ;;  %v852_v45 = vpack.c.b16 %v832_v40, %v832_v40  ;;  %v1006_v46 = vpack.c.b16 %v986_v41, %v986_v41  ;;  %v1007_v47 = vpack.c.b16 %v987_v42, %v987_v42  ;;  %v639_v42 = vpop.f32.mrf.mxu1 }
  0xae   : > { %v607_v48 = vpack.c.bf16 %v591_v43, %v591_v43  ;;  %v713_v38 = vunpack.c.l.b16 %v619_v33  ;;  %928 = vst.msk [vmem:[#allocation2 + $0x94] sm:$0xf] %vm889_vm1, %v619_v33  ;;  %v667_v43 = vpop.f32.mrf.mxu2 }
  0xaf   : > { %892 = vst.msk [vmem:[#allocation2 + $0x8] sm:$0xf] %vm889_vm1, %v851_v44 }
  0xb0   : > { %893 = vst.msk [vmem:[#allocation2 + $0xc] sm:$0xf] %vm889_vm1, %v852_v45  ;;  %v701_v50 = vunpack.c.l.b16 %v607_v48 }
  0xb1   : > { %1047 = vst.msk [vmem:[#allocation2 + $0xa8] sm:$0xf] %vm889_vm1, %v1006_v46  ;;  %v558_v51 = vpop.f32.mrf.mxu0 }
  0xb2   : > { %1048 = vst.msk [vmem:[#allocation2 + $0xac] sm:$0xf] %vm889_vm1, %v1007_v47  ;;  %v718_v52 = vpack.c.b16 %v701_v50, %v700_v49  ;;  %v559_v53 = vadd.f32 %v3564_v11, %v558_v51  ;;  %v724_v49 = vpack.c.b16 %v713_v38, %v712_v36 }
  0xb3   : > { %916 = vst.msk [vmem:[#allocation2 + $0x64] sm:$0xf] %vm889_vm1, %v607_v48 }
  0xb4   : > { %v741_v54 = vshrl.u32 %v718_v52, 16  ;;  %v744_v55 = vshll.u32 %v718_v52, 16  ;;  %v592_v56 = vmax.f32 %v559_v53, 0.0 }
  0xb5   : > { %v641_v2 = vpop.f32.mrf.mxu1 }
  0xb6   : > { %v743_v57 = vrot.slane %v741_v54, 7  ;;  %v935_v58 = vrot.slane %v744_v55, 1  ;;  %v608_v59 = vpack.c.bf16 %v592_v56, %v592_v56  ;;  %v786_v56 = vshll.u32 %v724_v49, 16 }
  0xb8   : > { %v746_v60 = vor.u32 %v744_v55, %v743_v57  ;;  %v936_v61 = vor.u32 %v935_v58, %v741_v54  ;;  %917 = vst.msk [vmem:[#allocation2 + $0x68] sm:$0xf] %vm889_vm1, %v608_v59  ;;  %v702_v14 = vunpack.c.l.b16 %v608_v59  ;;  %v783_v55 = vshrl.u32 %v724_v49, 16 }
  0xb9   : > { %v560_v62 = vpop.f32.mrf.mxu0 }
  0xba   : > { %v811_v63 = vsel %vm3571_vm6, 0, %v746_v60  ;;  %v966_v0 = vsel %vm3575_vm7, %v936_v61, 0  ;;  %v561_v1 = vadd.f32 %v3564_v11, %v560_v62  ;;  %v785_v59 = vrot.slane %v783_v55, 7 }
  0xbb   : > { %v833_v3 = vunpack.c.l.b16 %v811_v63  ;;  %v834_v4 = vunpack.c.h.b16 %v811_v63  ;;  %v988_v5 = vunpack.c.l.b16 %v966_v0  ;;  %v989_v6 = vunpack.c.h.b16 %v966_v0 }
  0xbc   : > { %v593_v7 = vmax.f32 %v561_v1, 0.0  ;;  %v947_v60 = vrot.slane %v786_v56, 1  ;;  %v788_v0 = vor.u32 %v786_v56, %v785_v59 }
  0xbd   : > { %v853_v8 = vpack.c.b16 %v833_v3, %v833_v3  ;;  %v854_v9 = vpack.c.b16 %v834_v4, %v834_v4  ;;  %v1008_v10 = vpack.c.b16 %v988_v5, %v988_v5  ;;  %v1009_v12 = vpack.c.b16 %v989_v6, %v989_v6  ;;  %v669_v3 = vpop.f32.mrf.mxu2 }
  0xbe   : > { %v609_v13 = vpack.c.bf16 %v593_v7, %v593_v7  ;;  %v948_v1 = vor.u32 %v947_v60, %v783_v55  ;;  %v640_v4 = vadd.f32 %v3564_v11, %v639_v42  ;;  %v668_v5 = vadd.f32 %v3564_v11, %v667_v43 }
  0xbf   : > { %894 = vst.msk [vmem:[#allocation2 + $0x10] sm:$0xf] %vm889_vm1, %v853_v8  ;;  %v642_v6 = vadd.f32 %v3564_v11, %v641_v2  ;;  %v670_v7 = vadd.f32 %v3564_v11, %v669_v3 }
  0xc0   : > { %895 = vst.msk [vmem:[#allocation2 + $0x14] sm:$0xf] %vm889_vm1, %v854_v9  ;;  %v703_v15 = vunpack.c.l.b16 %v609_v13  ;;  %v672_v33 = vmax.f32 %v668_v5, 0.0 }
  0xc1   : > { %1049 = vst.msk [vmem:[#allocation2 + $0xb0] sm:$0xf] %vm889_vm1, %v1008_v10  ;;  %v563_v16 = vpop.f32.mrf.mxu0  ;;  %v673_v38 = vmax.f32 %v670_v7, 0.0 }
  0xc2   : > { %1050 = vst.msk [vmem:[#allocation2 + $0xb4] sm:$0xf] %vm889_vm1, %v1009_v12  ;;  %v719_v17 = vpack.c.b16 %v703_v15, %v702_v14  ;;  %v564_v18 = vadd.f32 %v3564_v11, %v563_v16  ;;  %v817_v12 = vsel %vm3571_vm6, 0, %v788_v0  ;;  %v972_v15 = vsel %vm3575_vm7, %v948_v1, 0 }
  0xc3   : > { %918 = vst.msk [vmem:[#allocation2 + $0x6c] sm:$0xf] %vm889_vm1, %v609_v13  ;;  %v845_v13 = vunpack.c.l.b16 %v817_v12  ;;  %v846_v14 = vunpack.c.h.b16 %v817_v12  ;;  %v644_v16 = vmax.f32 %v640_v4, 0.0  ;;  %v1000_v20 = vunpack.c.l.b16 %v972_v15 }
  0xc4   : > { %v748_v22 = vshrl.u32 %v719_v17, 16  ;;  %v751_v23 = vshll.u32 %v719_v17, 16  ;;  %v594_v24 = vmax.f32 %v564_v18, 0.0 }
  0xc5   : > { %v865_v21 = vpack.c.b16 %v845_v13, %v845_v13 }
  0xc6   : > { %v750_v27 = vrot.slane %v748_v22, 7  ;;  %v937_v28 = vrot.slane %v751_v23, 1  ;;  %v610_v30 = vpack.c.bf16 %v594_v24, %v594_v24  ;;  %v646_v24 = vpack.c.bf16 %v644_v16, %v644_v16 }
  0xc7   : > { %906 = vst.msk [vmem:[#allocation2 + $0x40] sm:$0xf] %vm889_vm1, %v865_v21 }
  0xc8   : > { %v753_v34 = vor.u32 %v751_v23, %v750_v27  ;;  %v938_v35 = vor.u32 %v937_v28, %v748_v22  ;;  %919 = vst.msk [vmem:[#allocation2 + $0x70] sm:$0xf] %vm889_vm1, %v610_v30  ;;  %v704_v57 = vunpack.c.l.b16 %v610_v30  ;;  %v866_v22 = vpack.c.b16 %v846_v14, %v846_v14 }
  0xc9   : > { %v565_v37 = vpop.f32.mrf.mxu0  ;;  %v1001_v23 = vunpack.c.h.b16 %v972_v15  ;;  %v1020_v27 = vpack.c.b16 %v1000_v20, %v1000_v20  ;;  %v696_v31 = vunpack.c.l.b16 %v646_v24  ;;  %911 = vst.msk [vmem:[#allocation2 + $0x50] sm:$0xf] %vm889_vm1, %v646_v24 }
  0xca   : > { %v812_v39 = vsel %vm3571_vm6, 0, %v753_v34  ;;  %v967_v40 = vsel %vm3575_vm7, %v938_v35, 0  ;;  %v566_v41 = vadd.f32 %v3564_v11, %v565_v37  ;;  %v645_v34 = vmax.f32 %v642_v6, 0.0  ;;  %907 = vst.msk [vmem:[#allocation2 + $0x44] sm:$0xf] %vm889_vm1, %v866_v22 }
  0xcb   : > { %v835_v44 = vunpack.c.l.b16 %v812_v39  ;;  %v836_v45 = vunpack.c.h.b16 %v812_v39  ;;  %v990_v46 = vunpack.c.l.b16 %v967_v40  ;;  %v991_v47 = vunpack.c.h.b16 %v967_v40  ;;  %1061 = vst.msk [vmem:[#allocation2 + $0xe0] sm:$0xf] %vm889_vm1, %v1020_v27 }
  0xcc   : > { %v595_v48 = vmax.f32 %v566_v41, 0.0  ;;  %v1021_v30 = vpack.c.b16 %v1001_v23, %v1001_v23 }
  0xcd   : > { %v855_v50 = vpack.c.b16 %v835_v44, %v835_v44  ;;  %v856_v51 = vpack.c.b16 %v836_v45, %v836_v45  ;;  %v1010_v52 = vpack.c.b16 %v990_v46, %v990_v46  ;;  %v1011_v53 = vpack.c.b16 %v991_v47, %v991_v47 }
  0xce   : > { %v611_v54 = vpack.c.bf16 %v595_v48, %v595_v48  ;;  %1062 = vst.msk [vmem:[#allocation2 + $0xe4] sm:$0xf] %vm889_vm1, %v1021_v30  ;;  %v674_v44 = vpack.c.bf16 %v672_v33, %v672_v33  ;;  %v647_v45 = vpack.c.bf16 %v645_v34, %v645_v34  ;;  %v675_v46 = vpack.c.bf16 %v673_v38, %v673_v38 }
  0xcf   : > { %896 = vst.msk [vmem:[#allocation2 + $0x18] sm:$0xf] %vm889_vm1, %v855_v50 }
  0xd0   : > { %897 = vst.msk [vmem:[#allocation2 + $0x1c] sm:$0xf] %vm889_vm1, %v856_v51  ;;  %v705_v58 = vunpack.c.l.b16 %v611_v54 }
  0xd1   : > { %1051 = vst.msk [vmem:[#allocation2 + $0xb8] sm:$0xf] %vm889_vm1, %v1010_v52  ;;  %v568_v61 = vpop.f32.mrf.mxu0  ;;  %v714_v52 = vunpack.c.l.b16 %v674_v44 }
  0xd2   : > { %1052 = vst.msk [vmem:[#allocation2 + $0xbc] sm:$0xf] %vm889_vm1, %v1011_v53  ;;  %v720_v62 = vpack.c.b16 %v705_v58, %v704_v57  ;;  %v569_v63 = vadd.f32 %v3564_v11, %v568_v61  ;;  %v697_v53 = vunpack.c.l.b16 %v647_v45 }
  0xd3   : > { %920 = vst.msk [vmem:[#allocation2 + $0x74] sm:$0xf] %vm889_vm1, %v611_v54  ;;  %v715_v54 = vunpack.c.l.b16 %v675_v46 }
  0xd4   : > { %v755_v8 = vshrl.u32 %v720_v62, 16  ;;  %v758_v9 = vshll.u32 %v720_v62, 16  ;;  %v596_v10 = vmax.f32 %v569_v63, 0.0  ;;  %929 = vst.msk [vmem:[#allocation2 + $0x98] sm:$0xf] %vm889_vm1, %v674_v44  ;;  %v716_v57 = vpack.c.b16 %v697_v53, %v696_v31 }
  0xd5   : > { %v725_v58 = vpack.c.b16 %v715_v54, %v714_v52  ;;  %912 = vst.msk [vmem:[#allocation2 + $0x54] sm:$0xf] %vm889_vm1, %v647_v45 }
  0xd6   : > { %v757_v17 = vrot.slane %v755_v8, 7  ;;  %v939_v18 = vrot.slane %v758_v9, 1  ;;  %v612_v19 = vpack.c.bf16 %v596_v10, %v596_v10  ;;  %v727_v62 = vshrl.u32 %v716_v57, 16  ;;  %930 = vst.msk [vmem:[#allocation2 + $0x9c] sm:$0xf] %vm889_vm1, %v675_v46 }
  0xd7   : > { %v730_v63 = vshll.u32 %v716_v57, 16  ;;  %v790_v0 = vshrl.u32 %v725_v58, 16  ;;  %v793_v1 = vshll.u32 %v725_v58, 16 }
  0xd8   : > { %v760_v25 = vor.u32 %v758_v9, %v757_v17  ;;  %v940_v26 = vor.u32 %v939_v18, %v755_v8  ;;  %921 = vst.msk [vmem:[#allocation2 + $0x78] sm:$0xf] %vm889_vm1, %v612_v19  ;;  %v706_v55 = vunpack.c.l.b16 %v612_v19  ;;  %v729_v5 = vrot.slane %v727_v62, 7 }
  0xd9   : > { %v570_v28 = vpop.f32.mrf.mxu0  ;;  %v931_v6 = vrot.slane %v730_v63, 1  ;;  %v792_v7 = vrot.slane %v790_v0, 7  ;;  %v949_v8 = vrot.slane %v793_v1, 1 }
  0xda   : > { %v813_v35 = vsel %vm3571_vm6, 0, %v760_v25  ;;  %v968_v36 = vsel %vm3575_vm7, %v940_v26, 0  ;;  %v571_v37 = vadd.f32 %v3564_v11, %v570_v28  ;;  %v732_v13 = vor.u32 %v730_v63, %v729_v5 }
  0xdb   : > { %v837_v39 = vunpack.c.l.b16 %v813_v35  ;;  %v838_v40 = vunpack.c.h.b16 %v813_v35  ;;  %v992_v41 = vunpack.c.l.b16 %v968_v36  ;;  %v993_v42 = vunpack.c.h.b16 %v968_v36 }
  0xdc   : > { %v597_v43 = vmax.f32 %v571_v37, 0.0  ;;  %v932_v14 = vor.u32 %v931_v6, %v727_v62  ;;  %v809_v17 = vsel %vm3571_vm6, 0, %v732_v13  ;;  %v795_v18 = vor.u32 %v793_v1, %v792_v7 }
  0xdd   : > { %v857_v47 = vpack.c.b16 %v837_v39, %v837_v39  ;;  %v858_v48 = vpack.c.b16 %v838_v40, %v838_v40  ;;  %v1012_v49 = vpack.c.b16 %v992_v41, %v992_v41  ;;  %v1013_v50 = vpack.c.b16 %v993_v42, %v993_v42 }
  0xde   : > { %v613_v51 = vpack.c.bf16 %v597_v43, %v597_v43  ;;  %v829_v20 = vunpack.c.l.b16 %v809_v17  ;;  %v950_v21 = vor.u32 %v949_v8, %v790_v0  ;;  %v964_v25 = vsel %vm3575_vm7, %v932_v14, 0 }
  0xdf   : > { %898 = vst.msk [vmem:[#allocation2 + $0x20] sm:$0xf] %vm889_vm1, %v857_v47  ;;  %v830_v33 = vunpack.c.h.b16 %v809_v17  ;;  %v818_v35 = vsel %vm3571_vm6, 0, %v795_v18  ;;  %v984_v39 = vunpack.c.l.b16 %v964_v25  ;;  %v985_v42 = vunpack.c.h.b16 %v964_v25 }
  0xe0   : > { %899 = vst.msk [vmem:[#allocation2 + $0x24] sm:$0xf] %vm889_vm1, %v858_v48  ;;  %v707_v56 = vunpack.c.l.b16 %v613_v51  ;;  %v849_v34 = vpack.c.b16 %v829_v20, %v829_v20  ;;  %v847_v43 = vunpack.c.l.b16 %v818_v35  ;;  %v973_v44 = vsel %vm3575_vm7, %v950_v21, 0 }
  0xe1   : > { %1053 = vst.msk [vmem:[#allocation2 + $0xc0] sm:$0xf] %vm889_vm1, %v1012_v49  ;;  %v573_v59 = vpop.f32.mrf.mxu0  ;;  %v850_v47 = vpack.c.b16 %v830_v33, %v830_v33  ;;  %v848_v48 = vunpack.c.h.b16 %v818_v35  ;;  %v1004_v49 = vpack.c.b16 %v984_v39, %v984_v39  ;;  %v1005_v53 = vpack.c.b16 %v985_v42, %v985_v42 }
  0xe2   : > { %1054 = vst.msk [vmem:[#allocation2 + $0xc4] sm:$0xf] %vm889_vm1, %v1013_v50  ;;  %v721_v60 = vpack.c.b16 %v707_v56, %v706_v55  ;;  %v574_v61 = vadd.f32 %v3564_v11, %v573_v59  ;;  %v1002_v50 = vunpack.c.l.b16 %v973_v44  ;;  %v1003_v54 = vunpack.c.h.b16 %v973_v44 }
  0xe3   : > { %922 = vst.msk [vmem:[#allocation2 + $0x7c] sm:$0xf] %vm889_vm1, %v613_v51  ;;  %v867_v56 = vpack.c.b16 %v847_v43, %v847_v43  ;;  %v868_v59 = vpack.c.b16 %v848_v48, %v848_v48 }
  0xe4   : > { %v762_v2 = vshrl.u32 %v721_v60, 16  ;;  %v765_v3 = vshll.u32 %v721_v60, 16  ;;  %v598_v4 = vmax.f32 %v574_v61, 0.0  ;;  %890 = vst.msk [vmem:[#allocation2] sm:$0xf] %vm889_vm1, %v849_v34  ;;  %v1022_v61 = vpack.c.b16 %v1002_v50, %v1002_v50 }
  0xe5   : > { %891 = vst.msk [vmem:[#allocation2 + $0x4] sm:$0xf] %vm889_vm1, %v850_v47  ;;  %v1023_v0 = vpack.c.b16 %v1003_v54, %v1003_v54 }
  0xe6   : > { %v764_v9 = vrot.slane %v762_v2, 7  ;;  %v941_v10 = vrot.slane %v765_v3, 1  ;;  %v614_v12 = vpack.c.bf16 %v598_v4, %v598_v4  ;;  %1045 = vst.msk [vmem:[#allocation2 + $0xa0] sm:$0xf] %vm889_vm1, %v1004_v49 }
  0xe7   : > { %1046 = vst.msk [vmem:[#allocation2 + $0xa4] sm:$0xf] %vm889_vm1, %v1005_v53 }
  0xe8   : > { %v767_v15 = vor.u32 %v765_v3, %v764_v9  ;;  %v942_v16 = vor.u32 %v941_v10, %v762_v2  ;;  %923 = vst.msk [vmem:[#allocation2 + $0x80] sm:$0xf] %vm889_vm1, %v614_v12  ;;  %v708_v45 = vunpack.c.l.b16 %v614_v12 }
  0xe9   : > { %v575_v19 = vpop.f32.mrf.mxu0  ;;  %908 = vst.msk [vmem:[#allocation2 + $0x48] sm:$0xf] %vm889_vm1, %v867_v56 }
  0xea   : > { %v814_v22 = vsel %vm3571_vm6, 0, %v767_v15  ;;  %v969_v23 = vsel %vm3575_vm7, %v942_v16, 0  ;;  %v576_v24 = vadd.f32 %v3564_v11, %v575_v19  ;;  %909 = vst.msk [vmem:[#allocation2 + $0x4c] sm:$0xf] %vm889_vm1, %v868_v59 }
  0xeb   : > { %v839_v26 = vunpack.c.l.b16 %v814_v22  ;;  %v840_v27 = vunpack.c.h.b16 %v814_v22  ;;  %v994_v28 = vunpack.c.l.b16 %v969_v23  ;;  %v995_v30 = vunpack.c.h.b16 %v969_v23  ;;  %1063 = vst.msk [vmem:[#allocation2 + $0xe8] sm:$0xf] %vm889_vm1, %v1022_v61 }
  0xec   : > { %v599_v31 = vmax.f32 %v576_v24, 0.0  ;;  %1064 = vst.msk [vmem:[#allocation2 + $0xec] sm:$0xf] %vm889_vm1, %v1023_v0 }
  0xed   : > { %v859_v36 = vpack.c.b16 %v839_v26, %v839_v26  ;;  %v860_v37 = vpack.c.b16 %v840_v27, %v840_v27  ;;  %v1014_v38 = vpack.c.b16 %v994_v28, %v994_v28  ;;  %v1015_v40 = vpack.c.b16 %v995_v30, %v995_v30 }
  0xee   : > { %v615_v41 = vpack.c.bf16 %v599_v31, %v599_v31 }
  0xef   : > { %900 = vst.msk [vmem:[#allocation2 + $0x28] sm:$0xf] %vm889_vm1, %v859_v36 }
  0xf0   : > { %901 = vst.msk [vmem:[#allocation2 + $0x2c] sm:$0xf] %vm889_vm1, %v860_v37  ;;  %v709_v46 = vunpack.c.l.b16 %v615_v41 }
  0xf1   : > { %1055 = vst.msk [vmem:[#allocation2 + $0xc8] sm:$0xf] %vm889_vm1, %v1014_v38  ;;  %v578_v51 = vpop.f32.mrf.mxu0 }
  0xf2   : > { %1056 = vst.msk [vmem:[#allocation2 + $0xcc] sm:$0xf] %vm889_vm1, %v1015_v40  ;;  %v722_v52 = vpack.c.b16 %v709_v46, %v708_v45  ;;  %v579_v55 = vadd.f32 %v3564_v11, %v578_v51 }
  0xf3   : > { %924 = vst.msk [vmem:[#allocation2 + $0x84] sm:$0xf] %vm889_vm1, %v615_v41 }
  0xf4   : > { %v769_v57 = vshrl.u32 %v722_v52, 16  ;;  %v772_v58 = vshll.u32 %v722_v52, 16  ;;  %v600_v60 = vmax.f32 %v579_v55, 0.0 }
  0xf6   : > { %v771_v62 = vrot.slane %v769_v57, 7  ;;  %v943_v63 = vrot.slane %v772_v58, 1  ;;  %v616_v1 = vpack.c.bf16 %v600_v60, %v600_v60 }
  0xf8   : > { %v774_v2 = vor.u32 %v772_v58, %v771_v62  ;;  %v944_v3 = vor.u32 %v943_v63, %v769_v57  ;;  %925 = vst.msk [vmem:[#allocation2 + $0x88] sm:$0xf] %vm889_vm1, %v616_v1  ;;  %v710_v19 = vunpack.c.l.b16 %v616_v1 }
  0xf9   : > { %v580_v4 = vpop.f32.mrf.mxu0 }
  0xfa   : > { %v815_v5 = vsel %vm3571_vm6, 0, %v774_v2  ;;  %v970_v6 = vsel %vm3575_vm7, %v944_v3, 0  ;;  %v581_v7 = vadd.f32 %v3564_v11, %v580_v4 }
  0xfb   : > { %v841_v8 = vunpack.c.l.b16 %v815_v5  ;;  %v842_v9 = vunpack.c.h.b16 %v815_v5  ;;  %v996_v10 = vunpack.c.l.b16 %v970_v6  ;;  %v997_v12 = vunpack.c.h.b16 %v970_v6 }
  0xfc   : > { %v601_v13 = vmax.f32 %v581_v7, 0.0 }
  0xfd   : > { %v861_v14 = vpack.c.b16 %v841_v8, %v841_v8  ;;  %v862_v15 = vpack.c.b16 %v842_v9, %v842_v9  ;;  %v1016_v16 = vpack.c.b16 %v996_v10, %v996_v10  ;;  %v1017_v17 = vpack.c.b16 %v997_v12, %v997_v12 }
  0xfe   : > { %v617_v18 = vpack.c.bf16 %v601_v13, %v601_v13 }
  0xff   : > { %902 = vst.msk [vmem:[#allocation2 + $0x30] sm:$0xf] %vm889_vm1, %v861_v14 }
 0x100   : > { %903 = vst.msk [vmem:[#allocation2 + $0x34] sm:$0xf] %vm889_vm1, %v862_v15  ;;  %v711_v20 = vunpack.c.l.b16 %v617_v18 }
 0x101   : > { %1057 = vst.msk [vmem:[#allocation2 + $0xd0] sm:$0xf] %vm889_vm1, %v1016_v16 }
 0x102   : > { %1058 = vst.msk [vmem:[#allocation2 + $0xd4] sm:$0xf] %vm889_vm1, %v1017_v17  ;;  %v723_v11 = vpack.c.b16 %v711_v20, %v710_v19 }
 0x103   : > { %926 = vst.msk [vmem:[#allocation2 + $0x8c] sm:$0xf] %vm889_vm1, %v617_v18 }
 0x104   : > { %v776_v21 = vshrl.u32 %v723_v11, 16  ;;  %v779_v22 = vshll.u32 %v723_v11, 16 }
 0x106   : > { %v778_v23 = vrot.slane %v776_v21, 7  ;;  %v945_v24 = vrot.slane %v779_v22, 1 }
 0x108   : > { %v781_v25 = vor.u32 %v779_v22, %v778_v23  ;;  %v946_v26 = vor.u32 %v945_v24, %v776_v21 }
 0x10a   : > { %v816_v27 = vsel %vm3571_vm6, 0, %v781_v25  ;;  %v971_v28 = vsel %vm3575_vm7, %v946_v26, 0 }
 0x10b   : > { %v843_v30 = vunpack.c.l.b16 %v816_v27  ;;  %v844_v31 = vunpack.c.h.b16 %v816_v27  ;;  %v998_v33 = vunpack.c.l.b16 %v971_v28  ;;  %v999_v34 = vunpack.c.h.b16 %v971_v28 }
 0x10d   : > { %v863_v35 = vpack.c.b16 %v843_v30, %v843_v30  ;;  %v864_v36 = vpack.c.b16 %v844_v31, %v844_v31  ;;  %v1018_v37 = vpack.c.b16 %v998_v33, %v998_v33  ;;  %v1019_v38 = vpack.c.b16 %v999_v34, %v999_v34 }
 0x10e   : > { %1068 = sbr.rel (%p2847_p8) target bundleno = 282 (0x11a), region = 60 }
 0x10f   : > { %904 = vst.msk [vmem:[#allocation2 + $0x38] sm:$0xf] %vm889_vm1, %v863_v35 }
 0x110   : > { %905 = vst.msk [vmem:[#allocation2 + $0x3c] sm:$0xf] %vm889_vm1, %v864_v36 }
 0x111   : > { %1059 = vst.msk [vmem:[#allocation2 + $0xd8] sm:$0xf] %vm889_vm1, %v1018_v37 }
 0x112   : > { %1060 = vst.msk [vmem:[#allocation2 + $0xdc] sm:$0xf] %vm889_vm1, %v1019_v38 }
 0x113   : > { %v3437_v29 = vmov 0  }
 0x114   : > { %1069 = vst.msk [vmem:[#allocation2] sm:$0xf] %vm889_vm1, %v3437_v29 }
 0x115   : > { %1070 = vst.msk [vmem:[#allocation2 + $0x4] sm:$0xf] %vm889_vm1, %v3437_v29 }
 0x116   : > { %1071 = vst.msk [vmem:[#allocation2 + $0x50] sm:$0xf] %vm889_vm1, %v3437_v29 }
 0x117   : > { %1072 = vst.msk [vmem:[#allocation2 + $0x54] sm:$0xf] %vm889_vm1, %v3437_v29 }
 0x118   : > { %1073 = vst.msk [vmem:[#allocation2 + $0xa0] sm:$0xf] %vm889_vm1, %v3437_v29 }
 0x119   : > { %1074 = vst.msk [vmem:[#allocation2 + $0xa4] sm:$0xf] %vm889_vm1, %v3437_v29 }
 0x11a PF: > { %p2848_p9 = scmp.ne.s32.totalorder %s3419_s30, 1 }
 0x11c   : > { %1078 = sbr.rel (%p2848_p9) target bundleno = 296 (0x128), region = 64 }
 0x121   : > { %v3438_v32 = vmov 0  }
 0x122   : > { %1080 = vst.msk [vmem:[#allocation2 + $0x48] sm:$0xf] %vm889_vm1, %v3438_v32 }
 0x123   : > { %1081 = vst.msk [vmem:[#allocation2 + $0x4c] sm:$0xf] %vm889_vm1, %v3438_v32 }
 0x124   : > { %1082 = vst.msk [vmem:[#allocation2 + $0x98] sm:$0xf] %vm889_vm1, %v3438_v32 }
 0x125   : > { %1083 = vst.msk [vmem:[#allocation2 + $0x9c] sm:$0xf] %vm889_vm1, %v3438_v32 }
 0x126   : > { %1084 = vst.msk [vmem:[#allocation2 + $0xe8] sm:$0xf] %vm889_vm1, %v3438_v32 }
 0x127   : > { %1085 = vst.msk [vmem:[#allocation2 + $0xec] sm:$0xf] %vm889_vm1, %v3438_v32 }
 0x128 PF: > { %v2849_v39 = vld [vmem:[%s4062_s5 + $0x2] sm:$0x3]  ;;  %vm1186_vm8 = vcmask 1041408   ;;  %v1102_v40 = vld [vmem:[%s4062_s5] sm:$0x3]  ;;  %v3246_v43 = vld [vmem:[#allocation2 + $0x50] sm:$0xff] }
 0x129   : > { %v1188_v41 = vsel %vm1186_vm8, %v2849_v39, 0  ;;  %v1304_v42 = vsel %vm1186_vm8, %v1102_v40, 0  ;;  %v3247_v44 = vld [vmem:[#allocation2 + $0x58] sm:$0xff]  ;;  %vm1161_vm9 = vcmask 31744   ;;  %v3238_v45 = vld [vmem:[#allocation2] sm:$0xff]  ;;  %v3244_v51 = vld [vmem:[#allocation2 + $0x30] sm:$0xff] }
 0x12a   : > { %1197 = vmatpush.bf16.msra.mxu2 %v1188_v41  ;;  %3350 = vmatpush.bf16.msra.mxu3 %v1188_v41  ;;  %v3012_v46 = vld [vmem:[%s4062_s5 + $0x8] sm:$0x3]  ;;  %v2930_v48 = vld [vmem:[%s4062_s5 + $0x4] sm:$0x3]  ;;  %v2971_v53 = vld [vmem:[%s4062_s5 + $0x6] sm:$0x3] }
 0x12b   : > { %1313 = vmatpush.bf16.msrb.mxu1 %v1304_v42  ;;  %v1740_v47 = vsel %vm1186_vm8, %v3012_v46, 0  ;;  %v1438_v49 = vsel %vm1186_vm8, %v2930_v48, 0  ;;  %v3248_v50 = vld [vmem:[#allocation2 + $0x60] sm:$0xff]  ;;  %v3239_v52 = vld [vmem:[#allocation2 + $0x8] sm:$0xff]  ;;  %v1589_v54 = vsel %vm1186_vm8, %v2971_v53, 0  ;;  %v3245_v57 = vld [vmem:[#allocation2 + $0x38] sm:$0xff] }
 0x12c   : > { %v3262_v55 = vld [vmem:[#allocation2 + $0x8] sm:$0xff]  ;;  %1598 = vmatpush.bf16.msrb.mxu0 %v1589_v54  ;;  %v3240_v58 = vld [vmem:[#allocation2 + $0x10] sm:$0xff]  ;;  %v3254_v61 = vld [vmem:[#allocation2 + $0xa0] sm:$0xff]  ;;  %vm2616_vm10 = vcmask 125952  }
 0x12d   : > { %2882 = vmatmul.msk.bf16.vlgmr.msra.gmra.mxu2 %vm1161_vm9, %v3246_v43  ;;  %2883 = vmatmul.msk.bf16.vlgmr.msra.gmra.mxu3 %vm1161_vm9, %v3247_v44  ;;  %v3249_v56 = vld [vmem:[#allocation2 + $0x68] sm:$0xff]  ;;  %v3263_v59 = vld [vmem:[#allocation2 + $0x10] sm:$0xff]  ;;  %v3241_v62 = vld [vmem:[#allocation2 + $0x18] sm:$0xff] }
 0x12e   : > { %3351 = vmatpush.bf16.msrb.mxu2 %v1304_v42  ;;  %1749 = vmatpush.bf16.msrb.mxu3 %v1740_v47  ;;  %v3250_v60 = vld [vmem:[#allocation2 + $0x70] sm:$0xff]  ;;  %v3264_v63 = vld [vmem:[#allocation2 + $0x18] sm:$0xff]  ;;  %v3255_v1 = vld [vmem:[#allocation2 + $0xa8] sm:$0xff] }
 0x12f   : > { %2922 = vmatmul.msk.bf16.vlgmr.msrb.gmra.mxu1 %vm1161_vm9, %v3238_v45  ;;  %3004 = vmatmul.msk.bf16.vlgmr.msrb.gmra.mxu0 %vm1161_vm9, %v3262_v55  ;;  %v3251_v0 = vld [vmem:[#allocation2 + $0x78] sm:$0xff]  ;;  %v3242_v2 = vld [vmem:[#allocation2 + $0x20] sm:$0xff]  ;;  %v3094_v3 = vld [vmem:[%s4062_s5 + $0xc] sm:$0x3] }
 0x130   : > { %v2042_v4 = vsel %vm1186_vm8, %v3094_v3, 0  ;;  %v3265_v5 = vld [vmem:[#allocation2 + $0x20] sm:$0xff]  ;;  %v3256_v7 = vld [vmem:[#allocation2 + $0xb0] sm:$0xff]  ;;  %v3243_v8 = vld [vmem:[#allocation2 + $0x28] sm:$0xff] }
 0x131   : > { %v3252_v6 = vld [vmem:[#allocation2 + $0x80] sm:$0xff]  ;;  %v3176_v9 = vld [vmem:[%s4062_s5 + $0x10] sm:$0x3]  ;;  %v3135_v10 = vld [vmem:[%s4062_s5 + $0xe] sm:$0x3] }
 0x132   : > { %1447 = vmatpush.bf16.msra.mxu2 %v1438_v49  ;;  %v3053_v12 = vld [vmem:[%s4062_s5 + $0xa] sm:$0x3]  ;;  %v2344_v13 = vsel %vm1186_vm8, %v3176_v9, 0  ;;  %v2193_v14 = vsel %vm1186_vm8, %v3135_v10, 0  ;;  %v3257_v18 = vld [vmem:[#allocation2 + $0xb8] sm:$0xff]  ;;  %v3267_v20 = vld [vmem:[#allocation2 + $0x30] sm:$0xff] }
 0x133   : > { %v1891_v15 = vsel %vm1186_vm8, %v3053_v12, 0  ;;  %2353 = vmatpush.bf16.msra.mxu3 %v2344_v13  ;;  %2202 = vmatpush.bf16.msra.mxu0 %v2193_v14  ;;  %v3266_v16 = vld [vmem:[#allocation2 + $0x28] sm:$0xff]  ;;  %v3258_v11 = vld [vmem:[#allocation2 + $0xc0] sm:$0xff]  ;;  %v3270_v21 = vld [vmem:[#allocation2 + $0x58] sm:$0xff] }
 0x134   : > { %1900 = vmatpush.bf16.msra.mxu1 %v1891_v15  ;;  %v3253_v17 = vld [vmem:[#allocation2 + $0x88] sm:$0xff]  ;;  %v3279_v22 = vld [vmem:[#allocation2 + $0xb0] sm:$0xff]  ;;  %v3268_v23 = vld [vmem:[#allocation2 + $0x38] sm:$0xff] }
 0x135   : > { %v3278_v19 = vld [vmem:[#allocation2 + $0xa8] sm:$0xff]  ;;  %v3271_v25 = vld [vmem:[#allocation2 + $0x60] sm:$0xff]  ;;  %v3280_v26 = vld [vmem:[#allocation2 + $0xb8] sm:$0xff] }
 0x136   : > { %v3259_v24 = vld [vmem:[#allocation2 + $0xc8] sm:$0xff]  ;;  %v3269_v34 = vld [vmem:[#allocation2 + $0x40] sm:$0xff]  ;;  %v3260_v38 = vld [vmem:[#allocation2 + $0xd0] sm:$0xff] }
 0x137   : > { %v3272_v29 = vld [vmem:[#allocation2 + $0x68] sm:$0xff]  ;;  %v3281_v32 = vld [vmem:[#allocation2 + $0xc0] sm:$0xff]  ;;  %v3261_v49 = vld [vmem:[#allocation2 + $0xd8] sm:$0xff] }
 0x138   : > { %v3294_v46 = vld [vmem:[#allocation2 + $0x60] sm:$0xff]  ;;  %v3296_v9 = vld [vmem:[#allocation2 + $0x70] sm:$0xff]  ;;  %v3287_v15 = vld [vmem:[#allocation2 + $0x18] sm:$0xff] }
 0x139   : > { %v3275_v14 = vld [vmem:[#allocation2 + $0x80] sm:$0xff] }
 0x13d   : > { %2884 = vmatmul.msk.bf16.gmra.mxu3 %vm1161_vm9, %v3248_v50  ;;  %2928 = vmatmul.msk.bf16.vlgmr.msrb.gmra.mxu2 %vm1161_vm9, %v3244_v51  ;;  %v3273_v50 = vld [vmem:[#allocation2 + $0x70] sm:$0xff]  ;;  %v3282_v51 = vld [vmem:[#allocation2 + $0xc8] sm:$0xff] }
 0x13e   : > { %2051 = vmatpush.bf16.msrb.mxu2 %v2042_v4 }
 0x13f   : > { %2923 = vmatmul.msk.bf16.gmra.mxu1 %vm1161_vm9, %v3239_v52  ;;  %3005 = vmatmul.msk.bf16.gmra.mxu0 %vm1161_vm9, %v3263_v59 }
 0x14d   : > { %2885 = vmatmul.msk.bf16.gmra.mxu3 %vm1161_vm9, %v3249_v56  ;;  %2929 = vmatmul.msk.bf16.gmra.mxu2 %vm1161_vm9, %v3245_v57 }
 0x14f   : > { %2924 = vmatmul.msk.bf16.gmra.mxu1 %vm1161_vm9, %v3240_v58  ;;  %3006 = vmatmul.msk.bf16.gmra.mxu0 %vm1161_vm9, %v3264_v63  ;;  %v3295_v58 = vld [vmem:[#allocation2 + $0x68] sm:$0xff]  ;;  %v3286_v63 = vld [vmem:[#allocation2 + $0x10] sm:$0xff] }
 0x15d   : > { %2886 = vmatmul.msk.bf16.gmra.mxu3 %vm1161_vm9, %v3250_v60  ;;  %2963 = vmatmul.msk.bf16.vlgmr.msra.gmra.mxu2 %vm1161_vm9, %v3254_v61 }
 0x15f   : > { %2925 = vmatmul.msk.bf16.gmra.mxu1 %vm1161_vm9, %v3241_v62  ;;  %3007 = vmatmul.msk.bf16.gmra.mxu0 %vm1161_vm9, %v3265_v5  ;;  %v3274_v62 = vld [vmem:[#allocation2 + $0x78] sm:$0xff] }
 0x16d   : > { %2887 = vmatmul.msk.bf16.gmra.mxu3 %vm1161_vm9, %v3251_v0  ;;  %2964 = vmatmul.msk.bf16.gmra.mxu2 %vm1161_vm9, %v3255_v1  ;;  %v3283_v0 = vld [vmem:[#allocation2 + $0xd0] sm:$0xff] }
 0x16f   : > { %2926 = vmatmul.msk.bf16.gmra.mxu1 %vm1161_vm9, %v3242_v2  ;;  %3008 = vmatmul.msk.bf16.gmra.mxu0 %vm1161_vm9, %v3266_v16 }
 0x17d   : > { %2888 = vmatmul.msk.bf16.gmra.mxu3 %vm1161_vm9, %v3252_v6  ;;  %2965 = vmatmul.msk.bf16.gmra.mxu2 %vm1161_vm9, %v3256_v7 }
 0x17f   : > { %2927 = vmatmul.msk.bf16.gmra.mxu1 %vm1161_vm9, %v3243_v8  ;;  %3009 = vmatmul.msk.bf16.gmra.mxu0 %vm1161_vm9, %v3267_v20 }
 0x18d   : > { %2889 = vmatmul.msk.bf16.gmra.mxu3 %vm1161_vm9, %v3253_v17  ;;  %2966 = vmatmul.msk.bf16.gmra.mxu2 %vm1161_vm9, %v3257_v18  ;;  %v3284_v17 = vld [vmem:[#allocation2 + $0xd8] sm:$0xff] }
 0x18f   : > { %3086 = vmatmul.msk.bf16.vlgmr.msra.gmra.mxu1 %vm1161_vm9, %v3278_v19  ;;  %3010 = vmatmul.msk.bf16.gmra.mxu0 %vm1161_vm9, %v3268_v23 }
 0x19d   : > { %2967 = vmatmul.msk.bf16.gmra.mxu2 %vm1161_vm9, %v3258_v11  ;;  %3045 = vmatmul.msk.bf16.vlgmr.msrb.gmra.mxu3 %vm1161_vm9, %v3270_v21 }
 0x19f   : > { %3087 = vmatmul.msk.bf16.gmra.mxu1 %vm1161_vm9, %v3279_v22  ;;  %3011 = vmatmul.msk.bf16.gmra.mxu0 %vm1161_vm9, %v3269_v34  ;;  %v3285_v34 = vld [vmem:[#allocation2 + $0xe0] sm:$0xff] }
 0x1ac   : > { %v1315_v27 = vpop.f32.mrf.mxu1  ;;  %v1600_v44 = vpop.f32.mrf.mxu0 }
 0x1ad   : > { %2968 = vmatmul.msk.bf16.gmra.mxu2 %vm1161_vm9, %v3259_v24  ;;  %3046 = vmatmul.msk.bf16.gmra.mxu3 %vm1161_vm9, %v3271_v25 }
 0x1af   : > { %3088 = vmatmul.msk.bf16.gmra.mxu1 %vm1161_vm9, %v3280_v26  ;;  %3168 = vmatmul.msk.bf16.vlgmr.msra.gmra.mxu0 %vm1161_vm9, %v3294_v46  ;;  %v3297_v26 = vld [vmem:[#allocation2 + $0x78] sm:$0xff] }
 0x1b0   : > { %v1199_v28 = vpop.f32.mrf.mxu2  ;;  %v1204_v30 = vpop.f32.mrf.mxu3 }
 0x1b1   : > { %v1316_v31 = vadd.f32 %v1315_v27, %v1199_v28 }
 0x1b4   : > { %v1317_v33 = vpop.f32.mrf.mxu1  ;;  %v1602_v53 = vpop.f32.mrf.mxu0 }
 0x1b8   : > { %v1201_v35 = vpop.f32.mrf.mxu2  ;;  %v1206_v36 = vpop.f32.mrf.mxu3 }
 0x1b9   : > { %v1318_v37 = vadd.f32 %v1317_v33, %v1201_v35  ;;  %v3288_v33 = vld [vmem:[#allocation2 + $0x20] sm:$0xff] }
 0x1bc   : > { %v1320_v39 = vpop.f32.mrf.mxu1  ;;  %v1605_v59 = vpop.f32.mrf.mxu0 }
 0x1bd   : > { %v1321_v40 = vadd.f32 %v1320_v39, %v1204_v30  ;;  %2969 = vmatmul.msk.bf16.gmra.mxu2 %vm1161_vm9, %v3260_v38  ;;  %3047 = vmatmul.msk.bf16.gmra.mxu3 %vm1161_vm9, %v3272_v29 }
 0x1bf   : > { %3089 = vmatmul.msk.bf16.gmra.mxu1 %vm1161_vm9, %v3281_v32  ;;  %3169 = vmatmul.msk.bf16.gmra.mxu0 %vm1161_vm9, %v3295_v58 }
 0x1c0   : > { %v1209_v41 = vpop.f32.mrf.mxu3  ;;  %v3782_v42 = vpop.f32.mrf.mxu2 }
 0x1c4   : > { %v1322_v43 = vpop.f32.mrf.mxu1  ;;  %v1607_v3 = vpop.f32.mrf.mxu0 }
 0x1c5   : > { %v1323_v45 = vadd.f32 %v1322_v43, %v1206_v36  ;;  %v3298_v43 = vld [vmem:[#allocation2 + $0x80] sm:$0xff] }
 0x1c8   : > { %v3785_v47 = vpop.f32.mrf.mxu3  ;;  %v3787_v48 = vpop.f32.mrf.mxu2 }
 0x1cc   : > { %v1325_v52 = vpop.f32.mrf.mxu1  ;;  %v1610_v16 = vpop.f32.mrf.mxu0 }
 0x1cd   : > { %v3789_v54 = vadd.f32 %v1325_v52, %v1209_v41  ;;  %2970 = vmatmul.msk.bf16.gmra.mxu2 %vm1161_vm9, %v3261_v49  ;;  %3048 = vmatmul.msk.bf16.gmra.mxu3 %vm1161_vm9, %v3273_v50  ;;  %v3277_v52 = vld [vmem:[#allocation2 + $0x90] sm:$0xff] }
 0x1cf   : > { %3090 = vmatmul.msk.bf16.gmra.mxu1 %vm1161_vm9, %v3282_v51  ;;  %3170 = vmatmul.msk.bf16.gmra.mxu0 %vm1161_vm9, %v3296_v9 }
 0x1d0   : > { %v1214_v55 = vpop.f32.mrf.mxu3  ;;  %v3794_v56 = vpop.f32.mrf.mxu2 }
 0x1d4   : > { %v3796_v57 = vpop.f32.mrf.mxu1  ;;  %v1612_v25 = vpop.f32.mrf.mxu0 }
 0x1d8   : > { %v3799_v60 = vpop.f32.mrf.mxu3  ;;  %v3801_v61 = vpop.f32.mrf.mxu2 }
 0x1dc   : > { %v1330_v1 = vpop.f32.mrf.mxu1  ;;  %v1615_v38 = vpop.f32.mrf.mxu0 }
 0x1dd   : > { %v3803_v2 = vadd.f32 %v1330_v1, %v1214_v55  ;;  %3049 = vmatmul.msk.bf16.gmra.mxu3 %vm1161_vm9, %v3274_v62  ;;  %3127 = vmatmul.msk.bf16.vlgmr.msrb.gmra.mxu2 %vm1161_vm9, %v3286_v63  ;;  %v3299_v63 = vld [vmem:[#allocation2 + $0x88] sm:$0xff] }
 0x1df   : > { %3091 = vmatmul.msk.bf16.gmra.mxu1 %vm1161_vm9, %v3283_v0  ;;  %3171 = vmatmul.msk.bf16.gmra.mxu0 %vm1161_vm9, %v3297_v26 }
 0x1e0   : > { %v1219_v4 = vpop.f32.mrf.mxu3  ;;  %v1449_v5 = vpop.f32.mrf.mxu2 }
 0x1e1   : > { %v1489_v6 = vadd.f32 %v1449_v5, %v1316_v31  ;;  %v3276_v31 = vld [vmem:[#allocation2 + $0x88] sm:$0xff]  ;;  %v3302_v5 = vld [vmem:[#allocation2 + $0xb0] sm:$0xff] }
 0x1e3   : > { %v3810_v8 = vadd.f32 %v1600_v44, %v1489_v6  ;;  %v1328_v44 = vadd.f32 %v3796_v57, %v3785_v47 }
 0x1e4   : > { %v3808_v7 = vpop.f32.mrf.mxu1 }
 0x1e5   : > { %v1333_v0 = vadd.f32 %v3808_v7, %v3799_v60 }
 0x1e8   : > { %v3813_v10 = vpop.f32.mrf.mxu3  ;;  %v1451_v12 = vpop.f32.mrf.mxu2 }
 0x1e9   : > { %v1490_v13 = vadd.f32 %v1451_v12, %v1318_v37 }
 0x1eb   : > { %v3815_v19 = vadd.f32 %v1602_v53, %v1490_v13 }
 0x1ec   : > { %v1335_v18 = vpop.f32.mrf.mxu1 }
 0x1ed   : > { %v3817_v20 = vadd.f32 %v1335_v18, %v1219_v4  ;;  %3050 = vmatmul.msk.bf16.gmra.mxu3 %vm1161_vm9, %v3275_v14  ;;  %3128 = vmatmul.msk.bf16.gmra.mxu2 %vm1161_vm9, %v3287_v15  ;;  %v3290_v4 = vld [vmem:[#allocation2 + $0x30] sm:$0xff] }
 0x1ef   : > { %3092 = vmatmul.msk.bf16.gmra.mxu1 %vm1161_vm9, %v3284_v17  ;;  %3172 = vmatmul.msk.bf16.gmra.mxu0 %vm1161_vm9, %v3298_v43 }
 0x1f0   : > { %v1224_v11 = vpop.f32.mrf.mxu3  ;;  %v1454_v21 = vpop.f32.mrf.mxu2 }
 0x1f1   : > { %v1491_v22 = vadd.f32 %v1454_v21, %v1321_v40 }
 0x1f3   : > { %v3824_v24 = vadd.f32 %v1605_v59, %v1491_v22  ;;  %v3291_v22 = vld [vmem:[#allocation2 + $0x38] sm:$0xff] }
 0x1f4   : > { %v3822_v23 = vpop.f32.mrf.mxu1 }
 0x1f8   : > { %v3827_v27 = vpop.f32.mrf.mxu3  ;;  %v1456_v28 = vpop.f32.mrf.mxu2 }
 0x1f9   : > { %v1492_v30 = vadd.f32 %v1456_v28, %v1323_v45  ;;  %v1617_v45 = vpop.f32.mrf.mxu0 }
 0x1fb   : > { %v3829_v36 = vadd.f32 %v1607_v3, %v1492_v30 }
 0x1fc   : > { %v1340_v35 = vpop.f32.mrf.mxu1 }
 0x1fd   : > { %v3831_v37 = vadd.f32 %v1340_v35, %v1224_v11  ;;  %3051 = vmatmul.msk.bf16.gmra.mxu3 %vm1161_vm9, %v3276_v31  ;;  %3129 = vmatmul.msk.bf16.gmra.mxu2 %vm1161_vm9, %v3288_v33  ;;  %v3301_v31 = vld [vmem:[#allocation2 + $0x98] sm:$0xff] }
 0x1ff   : > { %3093 = vmatmul.msk.bf16.gmra.mxu1 %vm1161_vm9, %v3285_v34  ;;  %3173 = vmatmul.msk.bf16.gmra.mxu0 %vm1161_vm9, %v3299_v63 }
 0x200   : > { %v1229_v29 = vpop.f32.mrf.mxu3  ;;  %v1459_v32 = vpop.f32.mrf.mxu2 }
 0x201   : > { %v3837_v39 = vadd.f32 %v3782_v42, %v1229_v29  ;;  %v1493_v40 = vadd.f32 %v1459_v32, %v3789_v54  ;;  %v3289_v42 = vld [vmem:[#allocation2 + $0x28] sm:$0xff]  ;;  %v1620_v57 = vpop.f32.mrf.mxu0  ;;  %v3292_v32 = vld [vmem:[#allocation2 + $0x40] sm:$0xff] }
 0x203   : > { %v3840_v41 = vadd.f32 %v1610_v16, %v1493_v40  ;;  %v1338_v16 = vadd.f32 %v3822_v23, %v3813_v10  ;;  %v3304_v40 = vld [vmem:[#allocation2 + $0xc0] sm:$0xff] }
 0x204   : > { %v1342_v33 = vpop.f32.mrf.mxu1 }
 0x208   : > { %v1231_v46 = vpop.f32.mrf.mxu3  ;;  %v1461_v49 = vpop.f32.mrf.mxu2 }
 0x209   : > { %v3846_v50 = vadd.f32 %v3787_v48, %v1231_v46  ;;  %v1494_v51 = vadd.f32 %v1461_v49, %v1328_v44  ;;  %v2455_v48 = vld [vmem:[%s4064_s7] sm:$0x3]  ;;  %v1622_v9 = vpop.f32.mrf.mxu0 }
 0x20a   : > { %v2485_v59 = vsel %vm1186_vm8, %v2455_v48, 0 }
 0x20b   : > { %v3848_v53 = vadd.f32 %v1612_v25, %v1494_v51  ;;  %2494 = vmatpush.bf16.msrb.mxu1 %v2485_v59 }
 0x20d   : > { %3052 = vmatmul.msk.bf16.gmra.mxu3 %vm1161_vm9, %v3277_v52  ;;  %3130 = vmatmul.msk.bf16.gmra.mxu2 %vm1161_vm9, %v3289_v42 }
 0x210   : > { %v1234_v54 = vpop.f32.mrf.mxu3  ;;  %v1464_v55 = vpop.f32.mrf.mxu2 }
 0x211   : > { %v3853_v58 = vadd.f32 %v3794_v56, %v1234_v54  ;;  %v1495_v47 = vadd.f32 %v1464_v55, %v3803_v2  ;;  %v1625_v15 = vpop.f32.mrf.mxu0  ;;  %v3293_v54 = vld [vmem:[#allocation2 + $0x48] sm:$0xff] }
 0x212   : > { %v3305_v55 = vld [vmem:[#allocation2 + $0xc8] sm:$0xff] }
 0x213   : > { %v3860_v62 = vadd.f32 %v1615_v38, %v1495_v47 }
 0x218   : > { %v1236_v56 = vpop.f32.mrf.mxu3  ;;  %v1466_v1 = vpop.f32.mrf.mxu2 }
 0x219   : > { %v3866_v2 = vadd.f32 %v3801_v61, %v1236_v56  ;;  %v1496_v3 = vadd.f32 %v1466_v1, %v1333_v0  ;;  %v3300_v61 = vld [vmem:[#allocation2 + $0x90] sm:$0xff] }
 0x21a   : > { %3174 = vmatmul.msk.bf16.gmra.mxu0 %vm1161_vm9, %v3300_v61 }
 0x21b   : > { %v3868_v6 = vadd.f32 %v1617_v45, %v1496_v3  ;;  %v3306_v3 = vld [vmem:[#allocation2 + $0xd0] sm:$0xff] }
 0x21d   : > { %3131 = vmatmul.msk.bf16.gmra.mxu2 %vm1161_vm9, %v3290_v4  ;;  %3209 = vmatmul.msk.bf16.vlgmr.msra.gmra.mxu3 %vm1161_vm9, %v3302_v5 }
 0x220   : > { %v1469_v12 = vpop.f32.mrf.mxu2  ;;  %v1751_v13 = vpop.f32.mrf.mxu3 }
 0x221   : > { %v1497_v14 = vadd.f32 %v1469_v12, %v3817_v20  ;;  %v3874_v60 = vadd.f32 %v1751_v13, %v3810_v8  ;;  %v3303_v20 = vld [vmem:[#allocation2 + $0xb8] sm:$0xff]  ;;  %v1627_v8 = vpop.f32.mrf.mxu0 }
 0x222   : > { %v3307_v12 = vld [vmem:[#allocation2 + $0xd8] sm:$0xff] }
 0x223   : > { %v3876_v7 = vadd.f32 %v1620_v57, %v1497_v14 }
 0x228   : > { %v1471_v17 = vpop.f32.mrf.mxu2  ;;  %v1753_v18 = vpop.f32.mrf.mxu3 }
 0x229   : > { %v1498_v11 = vadd.f32 %v1471_v17, %v1338_v16  ;;  %v3882_v21 = vadd.f32 %v1753_v18, %v3815_v19  ;;  %v1343_v19 = vadd.f32 %v1342_v33, %v3827_v27  ;;  %v1630_v43 = vpop.f32.mrf.mxu0 }
 0x22a   : > { %3175 = vmatmul.msk.bf16.gmra.mxu0 %vm1161_vm9, %v3301_v31 }
 0x22b   : > { %v1649_v25 = vadd.f32 %v1622_v9, %v1498_v11 }
 0x22d   : > { %3132 = vmatmul.msk.bf16.gmra.mxu2 %vm1161_vm9, %v3291_v22  ;;  %3210 = vmatmul.msk.bf16.gmra.mxu3 %vm1161_vm9, %v3303_v20 }
 0x230   : > { %v1474_v26 = vpop.f32.mrf.mxu2  ;;  %v1756_v28 = vpop.f32.mrf.mxu3 }
 0x231   : > { %v1499_v30 = vadd.f32 %v1474_v26, %v3831_v37  ;;  %v3888_v10 = vadd.f32 %v1756_v28, %v3824_v24  ;;  %v1632_v49 = vpop.f32.mrf.mxu0  ;;  %v3309_v26 = vld [vmem:[#allocation2 + $0xe8] sm:$0xff] }
 0x233   : > { %v1650_v23 = vadd.f32 %v1625_v15, %v1499_v30  ;;  %v3308_v15 = vld [vmem:[#allocation2 + $0xe0] sm:$0xff] }
 0x238   : > { %v1476_v34 = vpop.f32.mrf.mxu2  ;;  %v1758_v35 = vpop.f32.mrf.mxu3 }
 0x239   : > { %v1500_v38 = vadd.f32 %v1476_v34, %v1343_v19  ;;  %v3893_v29 = vadd.f32 %v1758_v35, %v3829_v36 }
 0x23b   : > { %v1651_v37 = vadd.f32 %v1627_v8, %v1500_v38 }
 0x23d   : > { %3133 = vmatmul.msk.bf16.gmra.mxu2 %vm1161_vm9, %v3292_v32  ;;  %3211 = vmatmul.msk.bf16.gmra.mxu3 %vm1161_vm9, %v3304_v40 }
 0x240   : > { %v1479_v24 = vpop.f32.mrf.mxu2  ;;  %v1761_v44 = vpop.f32.mrf.mxu3 }
 0x241   : > { %v1501_v45 = vadd.f32 %v1479_v24, %v3837_v39  ;;  %v3899_v27 = vadd.f32 %v1761_v44, %v3840_v41  ;;  %v1635_v39 = vpop.f32.mrf.mxu0 }
 0x243   : > { %v1652_v46 = vadd.f32 %v1630_v43, %v1501_v45 }
 0x248   : > { %v1481_v51 = vpop.f32.mrf.mxu2  ;;  %v1763_v36 = vpop.f32.mrf.mxu3 }
 0x249   : > { %v1502_v52 = vadd.f32 %v1481_v51, %v3846_v50  ;;  %v3903_v42 = vadd.f32 %v1763_v36, %v3848_v53  ;;  %v1637_v50 = vpop.f32.mrf.mxu0  ;;  %v3941_v36 = vld [vmem:[%s4063_s6] ss:$0 sm:$0xff] }
 0x24b   : > { %v1653_v47 = vadd.f32 %v1632_v49, %v1502_v52 }
 0x24d   : > { %3134 = vmatmul.msk.bf16.gmra.mxu2 %vm1161_vm9, %v3293_v54  ;;  %3212 = vmatmul.msk.bf16.gmra.mxu3 %vm1161_vm9, %v3305_v55 }
 0x250   : > { %v1484_v57 = vpop.f32.mrf.mxu2  ;;  %v1766_v41 = vpop.f32.mrf.mxu3 }
 0x251   : > { %v1503_v48 = vadd.f32 %v1484_v57, %v3853_v58  ;;  %v3909_v59 = vadd.f32 %v1766_v41, %v3860_v62  ;;  %v2204_v17 = vpop.f32.mrf.mxu0 }
 0x253   : > { %v1654_v63 = vadd.f32 %v1635_v39, %v1503_v48 }
 0x258   : > { %v1486_v0 = vpop.f32.mrf.mxu2  ;;  %v1768_v53 = vpop.f32.mrf.mxu3 }
 0x259   : > { %v1504_v56 = vadd.f32 %v1486_v0, %v3866_v2  ;;  %v3913_v1 = vadd.f32 %v1768_v53, %v3868_v6  ;;  %v1902_v2 = vpop.f32.mrf.mxu1  ;;  %v2206_v20 = vpop.f32.mrf.mxu0 }
 0x25a   : > { %v1942_v40 = vadd.f32 %v1902_v2, %v3874_v60 }
 0x25b   : > { %v1655_v4 = vadd.f32 %v1637_v50, %v1504_v56 }
 0x25d   : > { %3213 = vmatmul.msk.bf16.gmra.mxu3 %vm1161_vm9, %v3306_v3 }
 0x260   : > { %v1771_v5 = vpop.f32.mrf.mxu3  ;;  %v2053_v16 = vpop.f32.mrf.mxu2 }
 0x261   : > { %v3917_v9 = vadd.f32 %v1771_v5, %v3876_v7  ;;  %v1904_v11 = vpop.f32.mrf.mxu1  ;;  %v2209_v33 = vpop.f32.mrf.mxu0  ;;  %v2093_v43 = vadd.f32 %v2053_v16, %v1942_v40 }
 0x262   : > { %v1943_v44 = vadd.f32 %v1904_v11, %v3882_v21 }
 0x268   : > { %v1773_v58 = vpop.f32.mrf.mxu3  ;;  %v2055_v22 = vpop.f32.mrf.mxu2 }
 0x269   : > { %v3919_v62 = vadd.f32 %v1773_v58, %v1649_v25  ;;  %v1907_v28 = vpop.f32.mrf.mxu1  ;;  %v2211_v32 = vpop.f32.mrf.mxu0  ;;  %v2094_v49 = vadd.f32 %v2055_v22, %v1943_v44 }
 0x26a   : > { %v1944_v21 = vadd.f32 %v1907_v28, %v3888_v10 }
 0x26b   : > { %v2245_v54 = vadd.f32 %v2206_v20, %v2094_v49 }
 0x26d   : > { %3214 = vmatmul.msk.bf16.gmra.mxu3 %vm1161_vm9, %v3307_v12 }
 0x270   : > { %v1776_v13 = vpop.f32.mrf.mxu3  ;;  %v2058_v30 = vpop.f32.mrf.mxu2 }
 0x271   : > { %v3922_v14 = vadd.f32 %v1776_v13, %v1650_v23  ;;  %v1909_v19 = vpop.f32.mrf.mxu1  ;;  %v2214_v52 = vpop.f32.mrf.mxu0  ;;  %v2095_v50 = vadd.f32 %v2058_v30, %v1944_v21 }
 0x272   : > { %v1945_v3 = vadd.f32 %v1909_v19, %v3893_v29 }
 0x278   : > { %v1778_v6 = vpop.f32.mrf.mxu3  ;;  %v2060_v34 = vpop.f32.mrf.mxu2 }
 0x279   : > { %v3924_v61 = vadd.f32 %v1778_v6, %v1651_v37  ;;  %v1912_v37 = vpop.f32.mrf.mxu1  ;;  %v2216_v53 = vpop.f32.mrf.mxu0  ;;  %v2096_v5 = vadd.f32 %v2060_v34, %v1945_v3 }
 0x27b   : > { %v2247_v2 = vadd.f32 %v2211_v32, %v2096_v5 }
 0x27d   : > { %3215 = vmatmul.msk.bf16.gmra.mxu3 %vm1161_vm9, %v3308_v15 }
 0x280   : > { %v1781_v7 = vpop.f32.mrf.mxu3  ;;  %v2063_v45 = vpop.f32.mrf.mxu2 }
 0x281   : > { %v3927_v18 = vadd.f32 %v1781_v7, %v1652_v46  ;;  %v2244_v46 = vadd.f32 %v2204_v17, %v2093_v43  ;;  %v1914_v39 = vpop.f32.mrf.mxu1  ;;  %v2219_v16 = vpop.f32.mrf.mxu0  ;;  %v1946_v7 = vadd.f32 %v1912_v37, %v3899_v27 }
 0x282   : > { %v1947_v30 = vadd.f32 %v1914_v39, %v3903_v42 }
 0x283   : > { %v2097_v20 = vadd.f32 %v2063_v45, %v1946_v7 }
 0x288   : > { %v1783_v25 = vpop.f32.mrf.mxu3  ;;  %v2065_v41 = vpop.f32.mrf.mxu2 }
 0x289   : > { %v3929_v8 = vadd.f32 %v1783_v25, %v1653_v47  ;;  %v1917_v58 = vpop.f32.mrf.mxu1  ;;  %v2221_v19 = vpop.f32.mrf.mxu0 }
 0x28a   : > { %v1948_v44 = vadd.f32 %v1917_v58, %v3909_v59 }
 0x28d   : > { %3216 = vmatmul.msk.bf16.gmra.mxu3 %vm1161_vm9, %v3309_v26 }
 0x290   : > { %v1786_v23 = vpop.f32.mrf.mxu3  ;;  %v2068_v13 = vpop.f32.mrf.mxu2 }
 0x291   : > { %v3932_v31 = vadd.f32 %v1786_v23, %v1654_v63  ;;  %v1919_v29 = vpop.f32.mrf.mxu1  ;;  %v2248_v23 = vadd.f32 %v2214_v52, %v2097_v20  ;;  %v2224_v42 = vpop.f32.mrf.mxu0  ;;  %v2099_v49 = vadd.f32 %v2068_v13, %v1948_v44 }
 0x298   : > { %v1788_v35 = vpop.f32.mrf.mxu3  ;;  %v2070_v26 = vpop.f32.mrf.mxu2 }
 0x299   : > { %v3934_v38 = vadd.f32 %v1788_v35, %v1655_v4  ;;  %v2246_v4 = vadd.f32 %v2209_v33, %v2095_v50  ;;  %v2098_v33 = vadd.f32 %v2065_v41, %v1947_v30  ;;  %v1922_v32 = vpop.f32.mrf.mxu1  ;;  %v2226_v21 = vpop.f32.mrf.mxu0 }
 0x29b   : > { %v2249_v35 = vadd.f32 %v2216_v53, %v2098_v33  ;;  %v1950_v53 = vadd.f32 %v1922_v32, %v3917_v9 }
 0x2a0   : > { %v2355_v24 = vpop.f32.mrf.mxu3  ;;  %v2073_v37 = vpop.f32.mrf.mxu2 }
 0x2a1   : > { %v2395_v51 = vadd.f32 %v2355_v24, %v2244_v46  ;;  %v2229_v13 = vpop.f32.mrf.mxu0 }
 0x2a3   : > { %v2415_v47 = vadd.f32 %v3941_v36, %v2395_v51 }
 0x2a5   : > { %v2431_v48 = vmax.f32 %v2415_v47, 0.0  ;;  %v2250_v47 = vadd.f32 %v2219_v16, %v2099_v49 }
 0x2a8   : > { %v2357_v55 = vpop.f32.mrf.mxu3  ;;  %v2075_v39 = vpop.f32.mrf.mxu2 }
 0x2a9   : > { %v2396_v60 = vadd.f32 %v2357_v55, %v2245_v54  ;;  %v1949_v54 = vadd.f32 %v1919_v29, %v3913_v1  ;;  %v1924_v55 = vpop.f32.mrf.mxu1  ;;  %v2231_v29 = vpop.f32.mrf.mxu0 }
 0x2ab   : > { %v2416_v57 = vadd.f32 %v3941_v36, %v2396_v60  ;;  %v2100_v60 = vadd.f32 %v2070_v26, %v1949_v54 }
 0x2ad   : > { %v2432_v63 = vmax.f32 %v2416_v57, 0.0  ;;  %v2251_v41 = vadd.f32 %v2221_v19, %v2100_v60 }
 0x2af   : > { %v2447_v0 = vpack.c.bf16 %v2432_v63, %v2431_v48 }
 0x2b0   : > { %v2360_v56 = vpop.f32.mrf.mxu3  ;;  %v2078_v3 = vpop.f32.mrf.mxu2 }
 0x2b1   : > { %3217 = vmatmul.msk.bf16.vlgmr.msrb.gmra.mxu1 %vm1161_vm9, %v2447_v0  ;;  %v2397_v12 = vadd.f32 %v2360_v56, %v2246_v4  ;;  %v1927_v0 = vpop.f32.mrf.mxu1  ;;  %v2101_v4 = vadd.f32 %v2073_v37, %v1950_v53 }
 0x2b2   : > { %v1952_v20 = vadd.f32 %v1927_v0, %v3922_v14 }
 0x2b3   : > { %v2417_v15 = vadd.f32 %v3941_v36, %v2397_v12  ;;  %v1951_v12 = vadd.f32 %v1924_v55, %v3919_v62 }
 0x2b4   : > { %v2103_v26 = vadd.f32 %v2078_v3, %v1952_v20 }
 0x2b5   : > { %v2433_v11 = vmax.f32 %v2417_v15, 0.0 }
 0x2b8   : > { %v2362_v6 = vpop.f32.mrf.mxu3 }
 0x2b9   : > { %v2398_v10 = vadd.f32 %v2362_v6, %v2247_v2  ;;  %v2252_v2 = vadd.f32 %v2224_v42, %v2101_v4  ;;  %v2102_v6 = vadd.f32 %v2075_v39, %v1951_v12 }
 0x2bb   : > { %v2418_v17 = vadd.f32 %v3941_v36, %v2398_v10  ;;  %v1929_v10 = vpop.f32.mrf.mxu1  ;;  %v2253_v16 = vadd.f32 %v2226_v21, %v2102_v6 }
 0x2bc   : > { %v1953_v33 = vadd.f32 %v1929_v10, %v3924_v61 }
 0x2bd   : > { %v2434_v22 = vmax.f32 %v2418_v17, 0.0  ;;  %v2080_v17 = vpop.f32.mrf.mxu2 }
 0x2bf   : > { %v2448_v25 = vpack.c.bf16 %v2434_v22, %v2433_v11 }
 0x2c0   : > { %v2365_v28 = vpop.f32.mrf.mxu3 }
 0x2c1   : > { %3218 = vmatmul.msk.bf16.gmra.mxu1 %vm1161_vm9, %v2448_v25  ;;  %v2399_v34 = vadd.f32 %v2365_v28, %v2248_v23 }
 0x2c3   : > { %v2419_v27 = vadd.f32 %v3941_v36, %v2399_v34  ;;  %v1932_v30 = vpop.f32.mrf.mxu1  ;;  %v2254_v34 = vadd.f32 %v2229_v13, %v2103_v26 }
 0x2c5   : > { %v2435_v45 = vmax.f32 %v2419_v27, 0.0  ;;  %v2083_v19 = vpop.f32.mrf.mxu2 }
 0x2c8   : > { %v2367_v40 = vpop.f32.mrf.mxu3 }
 0x2c9   : > { %v2400_v43 = vadd.f32 %v2367_v40, %v2249_v35  ;;  %v2104_v35 = vadd.f32 %v2080_v17, %v1953_v33  ;;  %v2234_v40 = vpop.f32.mrf.mxu0 }
 0x2cb   : > { %v2420_v24 = vadd.f32 %v3941_v36, %v2400_v43  ;;  %v2255_v27 = vadd.f32 %v2231_v29, %v2104_v35 }
 0x2cd   : > { %v2436_v46 = vmax.f32 %v2420_v24, 0.0  ;;  %v1934_v24 = vpop.f32.mrf.mxu1 }
 0x2ce   : > { %v1955_v55 = vadd.f32 %v1934_v24, %v3929_v8 }
 0x2cf   : > { %v2449_v51 = vpack.c.bf16 %v2436_v46, %v2435_v45  ;;  %v2085_v45 = vpop.f32.mrf.mxu2  ;;  %v1954_v46 = vadd.f32 %v1932_v30, %v3927_v18 }
 0x2d0   : > { %v2370_v52 = vpop.f32.mrf.mxu3  ;;  %v2106_v60 = vadd.f32 %v2085_v45, %v1955_v55 }
 0x2d1   : > { %3219 = vmatmul.msk.bf16.gmra.mxu1 %vm1161_vm9, %v2449_v51  ;;  %v2401_v57 = vadd.f32 %v2370_v52, %v2250_v47  ;;  %v2105_v49 = vadd.f32 %v2083_v19, %v1954_v46  ;;  %v2236_v52 = vpop.f32.mrf.mxu0  ;;  %v3342_v19 = vld [vmem:[%s3528_s25 + $0x8] sm:$0xff]  }
 0x2d2   : > { %v2257_v21 = vadd.f32 %v2236_v52, %v2106_v60  ;;  %v3317_v24 = vunpack.c.h.bf16 %v3342_v19 }
 0x2d3   : > { %v2421_v59 = vadd.f32 %v3941_v36, %v2401_v57  ;;  %v2256_v47 = vadd.f32 %v2234_v40, %v2105_v49 }
 0x2d5   : > { %v2437_v56 = vmax.f32 %v2421_v59, 0.0  ;;  %v1937_v39 = vpop.f32.mrf.mxu1 }
 0x2d6   : > { %v1956_v0 = vadd.f32 %v1937_v39, %v3932_v31 }
 0x2d8   : > { %v2372_v48 = vpop.f32.mrf.mxu3 }
 0x2d9   : > { %v2402_v63 = vadd.f32 %v2372_v48, %v2251_v41  ;;  %v2088_v41 = vpop.f32.mrf.mxu2 }
 0x2db   : > { %v2422_v50 = vadd.f32 %v3941_v36, %v2402_v63  ;;  %v2239_v63 = vpop.f32.mrf.mxu0 }
 0x2dd   : > { %v2438_v1 = vmax.f32 %v2422_v50, 0.0  ;;  %v1939_v8 = vpop.f32.mrf.mxu1 }
 0x2df   : > { %v2450_v5 = vpack.c.bf16 %v2438_v1, %v2437_v56  ;;  %v2107_v1 = vadd.f32 %v2088_v41, %v1956_v0 }
 0x2e0   : > { %v2375_v58 = vpop.f32.mrf.mxu3 }
 0x2e1   : > { %3220 = vmatmul.msk.bf16.gmra.mxu1 %vm1161_vm9, %v2450_v5  ;;  %v2403_v15 = vadd.f32 %v2375_v58, %v2252_v2  ;;  %v2090_v4 = vpop.f32.mrf.mxu2  ;;  %v1957_v58 = vadd.f32 %v1939_v8, %v3934_v38  ;;  %v2258_v12 = vadd.f32 %v2239_v63, %v2107_v1  ;;  %v3311_v38 = vld [vmem:[%s3528_s25] sm:$0xff]  }
 0x2e2   : > { %v3312_v29 = vunpack.c.l.bf16 %v3311_v38 }
 0x2e3   : > { %v2423_v9 = vadd.f32 %v3941_v36, %v2403_v15  ;;  %v2108_v13 = vadd.f32 %v2090_v4, %v1957_v58  ;;  %v2241_v2 = vpop.f32.mrf.mxu0  ;;  %v3345_v58 = vld [vmem:[%s3528_s25 + $0x20] sm:$0xff]  }
 0x2e5   : > { %v2439_v25 = vmax.f32 %v2423_v9, 0.0  ;;  %v2259_v15 = vadd.f32 %v2241_v2, %v2108_v13  ;;  %v3328_v2 = vunpack.c.l.bf16 %v3345_v58 }
 0x2e8   : > { %v2377_v7 = vpop.f32.mrf.mxu3 }
 0x2e9   : > { %v2404_v11 = vadd.f32 %v2377_v7, %v2253_v16 }
 0x2eb   : > { %v2424_v22 = vadd.f32 %v3941_v36, %v2404_v11 }
 0x2ed   : > { %v2440_v62 = vmax.f32 %v2424_v22, 0.0  ;;  %v3985_v22 = vld [vmem:[%s4065_s8] ss:$0 sm:$0xff] }
 0x2ef   : > { %v2451_v28 = vpack.c.bf16 %v2440_v62, %v2439_v25 }
 0x2f0   : > { %v2380_v23 = vpop.f32.mrf.mxu3 }
 0x2f1   : > { %3221 = vmatmul.msk.bf16.gmra.mxu1 %vm1161_vm9, %v2451_v28  ;;  %v2405_v32 = vadd.f32 %v2380_v23, %v2254_v34  ;;  %v3313_v28 = vunpack.c.h.bf16 %v3311_v38  ;;  %v3346_v38 = vld [vmem:[%s3528_s25 + $0x28] sm:$0xff]  }
 0x2f3   : > { %v2425_v37 = vadd.f32 %v3941_v36, %v2405_v32  ;;  %v3316_v32 = vunpack.c.l.bf16 %v3342_v19 }
 0x2f5   : > { %v2441_v42 = vmax.f32 %v2425_v37, 0.0 }
 0x2f8   : > { %v2382_v43 = vpop.f32.mrf.mxu3 }
 0x2f9   : > { %v2406_v14 = vadd.f32 %v2382_v43, %v2255_v27 }
 0x2fb   : > { %v2426_v44 = vadd.f32 %v3941_v36, %v2406_v14 }
 0x2fd   : > { %v2442_v61 = vmax.f32 %v2426_v44, 0.0 }
 0x2ff   : > { %v2452_v51 = vpack.c.bf16 %v2442_v61, %v2441_v42  ;;  %v3343_v42 = vld [vmem:[%s3528_s25 + $0x10] sm:$0xff]  }
 0x300   : > { %v2385_v54 = vpop.f32.mrf.mxu3  ;;  %v3321_v39 = vunpack.c.h.bf16 %v3343_v42 }
 0x301   : > { %3222 = vmatmul.msk.bf16.gmra.mxu1 %vm1161_vm9, %v2452_v51  ;;  %v2407_v57 = vadd.f32 %v2385_v54, %v2256_v47  ;;  %v3320_v51 = vunpack.c.l.bf16 %v3343_v42 }
 0x303   : > { %v2427_v59 = vadd.f32 %v3941_v36, %v2407_v57 }
 0x305   : > { %v2443_v53 = vmax.f32 %v2427_v59, 0.0 }
 0x308   : > { %v2387_v48 = vpop.f32.mrf.mxu3 }
 0x309   : > { %v2408_v18 = vadd.f32 %v2387_v48, %v2257_v21  ;;  %v3344_v48 = vld [vmem:[%s3528_s25 + $0x18] sm:$0xff]  }
 0x30a   : > { %v3324_v63 = vunpack.c.l.bf16 %v3344_v48  ;;  %v3325_v1 = vunpack.c.h.bf16 %v3344_v48 }
 0x30b   : > { %v2428_v50 = vadd.f32 %v3941_v36, %v2408_v18 }
 0x30d   : > { %v2444_v56 = vmax.f32 %v2428_v50, 0.0 }
 0x30f   : > { %v2453_v3 = vpack.c.bf16 %v2444_v56, %v2443_v53 }
 0x310   : > { %v2390_v5 = vpop.f32.mrf.mxu3 }
 0x311   : > { %3223 = vmatmul.msk.bf16.gmra.mxu1 %vm1161_vm9, %v2453_v3  ;;  %v2409_v6 = vadd.f32 %v2390_v5, %v2258_v12 }
 0x313   : > { %v2429_v31 = vadd.f32 %v3941_v36, %v2409_v6 }
 0x315   : > { %v2445_v7 = vmax.f32 %v2429_v31, 0.0 }
 0x318   : > { %v2392_v10 = vpop.f32.mrf.mxu3 }
 0x319   : > { %v2410_v16 = vadd.f32 %v2392_v10, %v2259_v15 }
 0x31b   : > { %v2430_v17 = vadd.f32 %v3941_v36, %v2410_v16 }
 0x31d   : > { %v2446_v9 = vmax.f32 %v2430_v17, 0.0  ;;  %v3329_v17 = vunpack.c.h.bf16 %v3345_v58 }
 0x31f   : > { %v2454_v11 = vpack.c.bf16 %v2446_v9, %v2445_v7 }
 0x321   : > { %3224 = vmatmul.msk.bf16.gmra.mxu1 %vm1161_vm9, %v2454_v11 }
 0x32e   : > { %v2496_v20 = vpop.f32.mrf.mxu1 }
 0x32f   : > { %v2497_v25 = vadd.f32 %v3985_v22, %v2496_v20 }
 0x331   : > { %v2568_v62 = vadd.f32 %v3312_v29, %v2497_v25  ;;  %v3332_v25 = vunpack.c.l.bf16 %v3346_v38 }
 0x333   : > { %v2584_v36 = vmax.f32 %v2568_v62, 0.0 }
 0x335   : > { %v2600_v26 = vpack.c.bf16 %v2584_v36, %v2584_v36 }
 0x336   : > { %v2498_v30 = vpop.f32.mrf.mxu1 }
 0x337   : > { %2617 = vst.msk [vmem:[%s3533_s28] sm:$0xf] %vm2616_vm10, %v2600_v26  ;;  %v2499_v23 = vadd.f32 %v3985_v22, %v2498_v30 }
 0x339   : > { %v2569_v33 = vadd.f32 %v3313_v28, %v2499_v23  ;;  %v3333_v23 = vunpack.c.h.bf16 %v3346_v38 }
 0x33b   : > { %v2585_v34 = vmax.f32 %v2569_v33, 0.0 }
 0x33d   : > { %v2601_v35 = vpack.c.bf16 %v2585_v34, %v2585_v34 }
 0x33e   : > { %v2501_v40 = vpop.f32.mrf.mxu1 }
 0x33f   : > { %2618 = vst.msk [vmem:[%s3533_s28 + $0x4] sm:$0xf] %vm2616_vm10, %v2601_v35  ;;  %v2502_v27 = vadd.f32 %v3985_v22, %v2501_v40  ;;  %v3347_v35 = vld [vmem:[%s3528_s25 + $0x30] sm:$0xff]  }
 0x341   : > { %v2570_v43 = vadd.f32 %v3316_v32, %v2502_v27  ;;  %v3336_v27 = vunpack.c.l.bf16 %v3347_v35 }
 0x343   : > { %v2586_v37 = vmax.f32 %v2570_v43, 0.0 }
 0x345   : > { %v2602_v14 = vpack.c.bf16 %v2586_v37, %v2586_v37 }
 0x346   : > { %v2503_v44 = vpop.f32.mrf.mxu1 }
 0x347   : > { %2619 = vst.msk [vmem:[%s3533_s28 + $0x8] sm:$0xf] %vm2616_vm10, %v2602_v14  ;;  %v2504_v45 = vadd.f32 %v3985_v22, %v2503_v44 }
 0x349   : > { %v2571_v46 = vadd.f32 %v3317_v24, %v2504_v45  ;;  %v3337_v45 = vunpack.c.h.bf16 %v3347_v35 }
 0x34b   : > { %v2587_v61 = vmax.f32 %v2571_v46, 0.0 }
 0x34d   : > { %v2603_v49 = vpack.c.bf16 %v2587_v61, %v2587_v61 }
 0x34e   : > { %v2506_v52 = vpop.f32.mrf.mxu1 }
 0x34f   : > { %2620 = vst.msk [vmem:[%s3533_s28 + $0xc] sm:$0xf] %vm2616_vm10, %v2603_v49  ;;  %v2507_v54 = vadd.f32 %v3985_v22, %v2506_v52  ;;  %v3348_v49 = vld [vmem:[%s3528_s25 + $0x38] sm:$0xff]  }
 0x351   : > { %v2572_v55 = vadd.f32 %v3320_v51, %v2507_v54  ;;  %v3340_v54 = vunpack.c.l.bf16 %v3348_v49 }
 0x353   : > { %v2588_v47 = vmax.f32 %v2572_v55, 0.0 }
 0x355   : > { %v2604_v60 = vpack.c.bf16 %v2588_v47, %v2588_v47 }
 0x356   : > { %v2508_v57 = vpop.f32.mrf.mxu1 }
 0x357   : > { %2621 = vst.msk [vmem:[%s3533_s28 + $0x10] sm:$0xf] %vm2616_vm10, %v2604_v60  ;;  %v2509_v41 = vadd.f32 %v3985_v22, %v2508_v57 }
 0x359   : > { %v2573_v21 = vadd.f32 %v3321_v39, %v2509_v41  ;;  %v3341_v41 = vunpack.c.h.bf16 %v3348_v49 }
 0x35b   : > { %v2589_v59 = vmax.f32 %v2573_v21, 0.0 }
 0x35d   : > { %v2605_v18 = vpack.c.bf16 %v2589_v59, %v2589_v59 }
 0x35e   : > { %v2511_v50 = vpop.f32.mrf.mxu1 }
 0x35f   : > { %2622 = vst.msk [vmem:[%s3533_s28 + $0x14] sm:$0xf] %vm2616_vm10, %v2605_v18  ;;  %v2512_v0 = vadd.f32 %v3985_v22, %v2511_v50 }
 0x361   : > { %v2574_v53 = vadd.f32 %v3324_v63, %v2512_v0 }
 0x363   : > { %v2590_v56 = vmax.f32 %v2574_v53, 0.0 }
 0x365   : > { %v2606_v8 = vpack.c.bf16 %v2590_v56, %v2590_v56 }
 0x366   : > { %v2513_v3 = vpop.f32.mrf.mxu1 }
 0x367   : > { %2623 = vst.msk [vmem:[%s3533_s28 + $0x18] sm:$0xf] %vm2616_vm10, %v2606_v8  ;;  %v2514_v4 = vadd.f32 %v3985_v22, %v2513_v3 }
 0x369   : > { %v2575_v5 = vadd.f32 %v3325_v1, %v2514_v4 }
 0x36b   : > { %v2591_v12 = vmax.f32 %v2575_v5, 0.0 }
 0x36d   : > { %v2607_v13 = vpack.c.bf16 %v2591_v12, %v2591_v12 }
 0x36e   : > { %v2516_v6 = vpop.f32.mrf.mxu1 }
 0x36f   : > { %2624 = vst.msk [vmem:[%s3533_s28 + $0x1c] sm:$0xf] %vm2616_vm10, %v2607_v13  ;;  %v2517_v15 = vadd.f32 %v3985_v22, %v2516_v6 }
 0x371   : > { %v2576_v10 = vadd.f32 %v3328_v2, %v2517_v15 }
 0x373   : > { %v2592_v31 = vmax.f32 %v2576_v10, 0.0 }
 0x375   : > { %v2608_v16 = vpack.c.bf16 %v2592_v31, %v2592_v31 }
 0x376   : > { %v2518_v7 = vpop.f32.mrf.mxu1 }
 0x377   : > { %2625 = vst.msk [vmem:[%s3533_s28 + $0x20] sm:$0xf] %vm2616_vm10, %v2608_v16  ;;  %v2519_v9 = vadd.f32 %v3985_v22, %v2518_v7 }
 0x379   : > { %v2577_v11 = vadd.f32 %v3329_v17, %v2519_v9 }
 0x37b   : > { %v2593_v29 = vmax.f32 %v2577_v11, 0.0 }
 0x37d   : > { %v2609_v20 = vpack.c.bf16 %v2593_v29, %v2593_v29 }
 0x37e   : > { %v2521_v62 = vpop.f32.mrf.mxu1 }
 0x37f   : > { %2626 = vst.msk [vmem:[%s3533_s28 + $0x24] sm:$0xf] %vm2616_vm10, %v2609_v20  ;;  %v2522_v36 = vadd.f32 %v3985_v22, %v2521_v62 }
 0x381   : > { %v2578_v26 = vadd.f32 %v3332_v25, %v2522_v36 }
 0x383   : > { %v2594_v28 = vmax.f32 %v2578_v26, 0.0 }
 0x385   : > { %v2610_v30 = vpack.c.bf16 %v2594_v28, %v2594_v28 }
 0x386   : > { %v2523_v33 = vpop.f32.mrf.mxu1 }
 0x387   : > { %2627 = vst.msk [vmem:[%s3533_s28 + $0x28] sm:$0xf] %vm2616_vm10, %v2610_v30  ;;  %v2524_v19 = vadd.f32 %v3985_v22, %v2523_v33 }
 0x389   : > { %v2579_v34 = vadd.f32 %v3333_v23, %v2524_v19 }
 0x38b   : > { %v2595_v32 = vmax.f32 %v2579_v34, 0.0 }
 0x38d   : > { %v2611_v40 = vpack.c.bf16 %v2595_v32, %v2595_v32 }
 0x38e   : > { %v2526_v43 = vpop.f32.mrf.mxu1 }
 0x38f   : > { %2628 = vst.msk [vmem:[%s3533_s28 + $0x2c] sm:$0xf] %vm2616_vm10, %v2611_v40  ;;  %v2527_v37 = vadd.f32 %v3985_v22, %v2526_v43 }
 0x391   : > { %v2580_v14 = vadd.f32 %v3336_v27, %v2527_v37 }
 0x393   : > { %v2596_v24 = vmax.f32 %v2580_v14, 0.0 }
 0x395   : > { %v2612_v44 = vpack.c.bf16 %v2596_v24, %v2596_v24 }
 0x396   : > { %v2528_v46 = vpop.f32.mrf.mxu1 }
 0x397   : > { %2629 = vst.msk [vmem:[%s3533_s28 + $0x30] sm:$0xf] %vm2616_vm10, %v2612_v44  ;;  %v2529_v42 = vadd.f32 %v3985_v22, %v2528_v46 }
 0x399   : > { %v2581_v61 = vadd.f32 %v3337_v45, %v2529_v42 }
 0x39b   : > { %v2597_v51 = vmax.f32 %v2581_v61, 0.0 }
 0x39d   : > { %v2613_v52 = vpack.c.bf16 %v2597_v51, %v2597_v51 }
 0x39e   : > { %v2531_v55 = vpop.f32.mrf.mxu1 }
 0x39f   : > { %2630 = vst.msk [vmem:[%s3533_s28 + $0x34] sm:$0xf] %vm2616_vm10, %v2613_v52  ;;  %v2532_v47 = vadd.f32 %v3985_v22, %v2531_v55 }
 0x3a1   : > { %v2582_v60 = vadd.f32 %v3340_v54, %v2532_v47 }
 0x3a3   : > { %v2598_v39 = vmax.f32 %v2582_v60, 0.0 }
 0x3a5   : > { %v2614_v57 = vpack.c.bf16 %v2598_v39, %v2598_v39 }
 0x3a6   : > { %v2533_v21 = vpop.f32.mrf.mxu1 }
 0x3a7   : > { %2631 = vst.msk [vmem:[%s3533_s28 + $0x38] sm:$0xf] %vm2616_vm10, %v2614_v57  ;;  %v2534_v48 = vadd.f32 %v3985_v22, %v2533_v21 }
 0x3a9   : > { %v2583_v59 = vadd.f32 %v3341_v41, %v2534_v48 }
 0x3ab   : > { %v2599_v18 = vmax.f32 %v2583_v59, 0.0 }
 0x3ad   : > { %v2615_v63 = vpack.c.bf16 %v2599_v18, %v2599_v18 }
 0x3af   : > { %2632 = vst.msk [vmem:[%s3533_s28 + $0x3c] sm:$0xf] %vm2616_vm10, %v2615_v63 }
 0x3b0 PF: > { %s19_s13 = sadd.s32 1, %s3435_s13   ;;  %s4071_s30 = smov %s3427_s11 }
 0x3b1   : > { %p16_p10 = scmp.ge.s32.totalorder %s19_s13, 6   ;;  %s4072_s10 = smov %s3431_s12 }
 0x3b2   : > { %s4073_s11 = smov %s4076_s14  ;;  %s4074_s12 = smov %s4080_s15 }
 0x3b3   :  { %18 = sbr.rel (!%p16_p10) target bundleno = 3 (0x3), region = 117 }

</bundles_post_ra>
